<compile_context>
chip_gen: v7x
topology: tpu7x:2x2x1
jax: 0.10.0
libtpu: 0.0.40
codegen_flags: <defaults>
</compile_context>

<pallas_src>
import functools

import numpy as np
import jax
import jax.numpy as jnp
from jax import lax
from jax.experimental import pallas as pl
from jax.experimental.pallas import tpu as pltpu

CONV_C = 16          # channels of every conv layer
HEAD_H = 64          # hidden width of each head (pi + v fused -> 128 lanes)


def _conv_out(s):
    return (s + 2 - 3) // 2 + 1     # k=3, stride=2, pad=1


def _round_up(x, m):
    return (x + m - 1) // m * m


# ------------------------------ Pallas kernel ------------------------------ #

def _fused_cnn_kernel(x_ref, m1_ref, b1_ref, m2_ref, b2_ref, m3_ref, b3_ref,
                      w1h_ref, b1h_ref, w2h_ref, b2h_ref, out_ref):
    f32 = jnp.float32
    bf16 = jnp.bfloat16

    # conv1 + ReLU  : (BT, HH*WW) @ (HH*WW, S1*C)
    x = x_ref[...].astype(bf16)
    a1 = jnp.dot(x, m1_ref[...], preferred_element_type=f32)
    a1 = jnp.maximum(a1 + b1_ref[...], 0.0)

    # conv2 + ReLU  : (BT, S1*C) @ (S1*C, S2*C)
    a2 = jnp.dot(a1.astype(bf16), m2_ref[...], preferred_element_type=f32)
    a2 = jnp.maximum(a2 + b2_ref[...], 0.0)

    # conv3 + ReLU  : (BT, S2*C) @ (S2*C, S3*C)
    a3 = jnp.dot(a2.astype(bf16), m3_ref[...], preferred_element_type=f32)
    a3 = jnp.maximum(a3 + b3_ref[...], 0.0)

    # fused policy+value hidden: lanes 0..63 = pi hidden, 64..127 = v hidden
    h = jnp.dot(a3.astype(bf16), w1h_ref[...], preferred_element_type=f32)
    h = jnp.maximum(h + b1h_ref[...], 0.0)

    # block-diagonal second layer, padded to a lane-dense OUT_PAD output:
    # columns [0:A] = logits, column A = value, rest = zero padding.
    out = jnp.dot(h.astype(bf16), w2h_ref[...], preferred_element_type=f32)
    out_ref[...] = out + b2h_ref[...]


# ------------------------------- forward ----------------------------------- #

def cnn_forward(obs, kp, HH, WW, output_size):
    """obs: (..., HH, WW) float32 -> (logits (B, A), value (B, 1))."""
    x = obs.astype(jnp.float32).reshape(-1, HH * WW)         # lane-dense input
    B = x.shape[0]
    HW = HH * WW
    OH1, OW1 = _conv_out(HH), _conv_out(WW)
    OH2, OW2 = _conv_out(OH1), _conv_out(OW1)
    OH3, OW3 = _conv_out(OH2), _conv_out(OW2)
    S1, S2, S3 = OH1 * OW1, OH2 * OW2, OH3 * OW3
    C = CONV_C
    A = output_size
    OUT_PAD = kp["w2h"].shape[-1]

    # batch tiling: BT multiple of 8 (sublane), up to 128; pad B up to a
    # multiple of BT so the grid is exact (padded rows are sliced off below).
    BT = min(128, _round_up(B, 8))
    Bp = _round_up(B, BT)
    if Bp != B:
        x = jnp.pad(x, ((0, Bp - B), (0, 0)))

    def const_spec(arr):
        shp = arr.shape
        return pl.BlockSpec(shp, lambda i, z=(0,) * len(shp): z)

    in_specs = [
        pl.BlockSpec((BT, HW), lambda i: (i, 0)),            # per-tile images
        const_spec(kp["m1"]), const_spec(kp["b1"]),
        const_spec(kp["m2"]), const_spec(kp["b2"]),
        const_spec(kp["m3"]), const_spec(kp["b3"]),
        const_spec(kp["w1h"]), const_spec(kp["b1h"]),
        const_spec(kp["w2h"]), const_spec(kp["b2h"]),
    ]
    out_specs = pl.BlockSpec((BT, OUT_PAD), lambda i: (i, 0))
    out_shape = jax.ShapeDtypeStruct((Bp, OUT_PAD), jnp.float32)

    flops = 2 * Bp * (HW * S1 * C + S1 * C * S2 * C + S2 * C * S3 * C
                      + S3 * C * 2 * HEAD_H + 2 * HEAD_H * OUT_PAD)
    weight_bytes = sum(int(np.prod(v.shape)) * v.dtype.itemsize
                       for v in kp.values())
    bytes_accessed = 4 * Bp * HW + weight_bytes + 4 * Bp * OUT_PAD

    out = pl.pallas_call(
        _fused_cnn_kernel,
        grid=(Bp // BT,),
        in_specs=in_specs,
        out_specs=out_specs,
        out_shape=out_shape,
        compiler_params=pltpu.CompilerParams(
            dimension_semantics=("parallel",),
            vmem_limit_bytes=32 * 1024 * 1024,
        ),
        cost_estimate=pl.CostEstimate(flops=int(flops), transcendentals=0,
                                      bytes_accessed=int(bytes_accessed)),
    )(x, kp["m1"], kp["b1"], kp["m2"], kp["b2"], kp["m3"], kp["b3"],
      kp["w1h"], kp["b1h"], kp["w2h"], kp["b2h"])

    out = out[:B]
    return out[:, :A], out[:, A:A + 1]


# ------------------------------ parameters ---------------------------------- #

def init_torch_params(key, HH, WW, output_size):
    """PyTorch-layout params, kaiming-normal fan_in + zero bias (init_weights)."""
    ks = jax.random.split(key, 7)

    def kaiming(k, shape, fan_in):
        return jax.random.normal(k, shape, jnp.float32) * np.sqrt(2.0 / fan_in)

    oh, ow = HH, WW
    for _ in range(3):
        oh, ow = _conv_out(oh), _conv_out(ow)
    F = CONV_C * oh * ow

    return {
        "conv1_w": kaiming(ks[0], (CONV_C, 1, 3, 3), 1 * 9),
        "conv1_b": jnp.zeros((CONV_C,), jnp.float32),
        "conv2_w": kaiming(ks[1], (CONV_C, CONV_C, 3, 3), CONV_C * 9),
        "conv2_b": jnp.zeros((CONV_C,), jnp.float32),
        "conv3_w": kaiming(ks[2], (CONV_C, CONV_C, 3, 3), CONV_C * 9),
        "conv3_b": jnp.zeros((CONV_C,), jnp.float32),
        "pi_w1": kaiming(ks[3], (HEAD_H, F), F),
        "pi_b1": jnp.zeros((HEAD_H,), jnp.float32),
        "pi_w2": kaiming(ks[4], (output_size, HEAD_H), HEAD_H),
        "pi_b2": jnp.zeros((output_size,), jnp.float32),
        "v_w1": kaiming(ks[5], (HEAD_H, F), F),
        "v_b1": jnp.zeros((HEAD_H,), jnp.float32),
        "v_w2": kaiming(ks[6], (1, HEAD_H), HEAD_H),
        "v_b2": jnp.zeros((1,), jnp.float32),
    }


def _conv_toeplitz(w, h_in, w_in, h_out, w_out):
    """Dense Toeplitz matrix of a k=3, stride=2, pad=1 conv.

    w: (Cout, Cin, 3, 3).  Returns M (h_in*w_in*Cin, h_out*w_out*Cout) with
    input layout  idx = (ih*w_in + iw)*Cin + ci   and
    output layout idx = (oh*w_out + ow)*Cout + co, so that
    a_out = a_in_flat @ M  reproduces the conv (padding rows are simply absent).
    """
    w_np = np.asarray(w, np.float32)
    cout, cin = w_np.shape[0], w_np.shape[1]
    M = np.zeros((h_in * w_in * cin, h_out * w_out * cout), np.float32)
    for oh in range(h_out):
        for kh in range(3):
            ih = 2 * oh + kh - 1
            if not (0 <= ih < h_in):
                continue
            for ow in range(w_out):
                for kw in range(3):
                    iw = 2 * ow + kw - 1
                    if not (0 <= iw < w_in):
                        continue
                    p_in = ih * w_in + iw
                    p_out = oh * w_out + ow
                    M[p_in * cin:(p_in + 1) * cin,
                      p_out * cout:(p_out + 1) * cout] = w_np[:, :, kh, kw].T
    return M


def prepare_kernel_params(tp, HH, WW, output_size, weight_dtype=jnp.bfloat16):
    """One-time layout of weights into kernel-friendly Toeplitz/head matrices."""
    C = CONV_C
    OH1, OW1 = _conv_out(HH), _conv_out(WW)
    OH2, OW2 = _conv_out(OH1), _conv_out(OW1)
    OH3, OW3 = _conv_out(OH2), _conv_out(OW2)
    S1, S2, S3 = OH1 * OW1, OH2 * OW2, OH3 * OW3
    A = output_size
    OUT_PAD = max(128, _round_up(A + 1, 128))      # lane-dense fused output

    m1 = _conv_toeplitz(tp["conv1_w"], HH, WW, OH1, OW1)      # (HW,    S1*C)
    m2 = _conv_toeplitz(tp["conv2_w"], OH1, OW1, OH2, OW2)    # (S1*C,  S2*C)
    m3 = _conv_toeplitz(tp["conv3_w"], OH2, OW2, OH3, OW3)    # (S2*C,  S3*C)

    # per-pixel bias tiles in the (pixel, channel) activation layout
    b1 = np.tile(np.asarray(tp["conv1_b"], np.float32), S1).reshape(1, S1 * C)
    b2 = np.tile(np.asarray(tp["conv2_b"], np.float32), S2).reshape(1, S2 * C)
    b3 = np.tile(np.asarray(tp["conv3_b"], np.float32), S3).reshape(1, S3 * C)

    # fused head first layer: concat [pi | v] -> (F, 128) then permute from the
    # PyTorch NCHW flatten order (f = c*S3 + p) to the kernel activation layout
    # (p*C + c), so hidden = a3_flat @ w1h matches the reference exactly.
    w1cat = np.concatenate([np.asarray(tp["pi_w1"], np.float32).T,
                            np.asarray(tp["v_w1"], np.float32).T], axis=1)
    w1h = w1cat.reshape(C, S3, 2 * HEAD_H).transpose(1, 0, 2)
    w1h = w1h.reshape(S3 * C, 2 * HEAD_H)
    b1h = np.concatenate([np.asarray(tp["pi_b1"], np.float32),
                          np.asarray(tp["v_b1"], np.float32)]).reshape(1, -1)

    # block-diagonal second layer, zero-padded to OUT_PAD lane-dense columns:
    # cols [0:A] = policy logits, col A = value, rest zeros.
    w2h = np.zeros((2 * HEAD_H, OUT_PAD), np.float32)
    w2h[:HEAD_H, :A] = np.asarray(tp["pi_w2"], np.float32).T
    w2h[HEAD_H:, A:A + 1] = np.asarray(tp["v_w2"], np.float32).T
    b2h = np.zeros((1, OUT_PAD), np.float32)
    b2h[0, :A] = np.asarray(tp["pi_b2"], np.float32)
    b2h[0, A] = np.asarray(tp["v_b2"], np.float32)[0]

    wd = weight_dtype
    return {
        "m1": jnp.asarray(m1, wd), "b1": jnp.asarray(b1, jnp.float32),
        "m2": jnp.asarray(m2, wd), "b2": jnp.asarray(b2, jnp.float32),
        "m3": jnp.asarray(m3, wd), "b3": jnp.asarray(b3, jnp.float32),
        "w1h": jnp.asarray(w1h, wd), "b1h": jnp.asarray(b1h, jnp.float32),
        "w2h": jnp.asarray(w2h, wd), "b2h": jnp.asarray(b2h, jnp.float32),
    }


# --------------------------- plain-JAX reference ----------------------------- #

def reference_forward(obs, tp, HH, WW):
    x = obs.astype(jnp.float32).reshape(-1, 1, HH, WW)
    for i in (1, 2, 3):
        x = lax.conv_general_dilated(
            x, tp[f"conv{i}_w"], window_strides=(2, 2),
            padding=((1, 1), (1, 1)),
            dimension_numbers=("NCHW", "OIHW", "NCHW"))
        x = jax.nn.relu(x + tp[f"conv{i}_b"].reshape(1, -1, 1, 1))
    feats = x.reshape(x.shape[0], -1)
    pi = jax.nn.relu(feats @ tp["pi_w1"].T + tp["pi_b1"]) @ tp["pi_w2"].T + tp["pi_b2"]
    v = jax.nn.relu(feats @ tp["v_w1"].T + tp["v_b1"]) @ tp["v_w2"].T + tp["v_b2"]
    return pi, v


# ---------------------------------- main ------------------------------------- #

if __name__ == "__main__":
    W = H = 16           # observation_space.shape
    OUTPUT_SIZE = 4      # action logits
    BATCH = 2

    key = jax.random.PRNGKey(0)
    pkey, okey = jax.random.split(key)

    torch_params = init_torch_params(pkey, W, H, OUTPUT_SIZE)
    kernel_params = prepare_kernel_params(torch_params, W, H, OUTPUT_SIZE)
    obs = jax.random.uniform(okey, (BATCH, W, H), dtype=jnp.float32)

    fwd = jax.jit(functools.partial(cnn_forward, HH=W, WW=H,
                                    output_size=OUTPUT_SIZE))
    logits, value = fwd(obs, kernel_params)
    jax.block_until_ready((logits, value))

    assert logits.shape == (BATCH, OUTPUT_SIZE), logits.shape
    assert value.shape == (BATCH, 1), value.shape

    # Sanity check against a plain-XLA f32 reference of the PyTorch module.
    # Tolerance is 5e-2 because the kernel intentionally stores weights and
    # casts activations to bfloat16 for the MXU (f32 accumulation); expected
    # deviation is ~1-2% relative across the 5 chained matmuls.
    ref_logits, ref_value = reference_forward(obs, torch_params, W, H)
    np.testing.assert_allclose(np.asarray(logits), np.asarray(ref_logits),
                               rtol=5e-2, atol=5e-2)
    np.testing.assert_allclose(np.asarray(value), np.asarray(ref_value),
                               rtol=5e-2, atol=5e-2)

    print("KERNEL_OK")
</pallas_src>

<mosaic_0001>
module attributes {stable_mosaic.version = 11 : i64} {
  func.func @_fused_cnn_kernel(%arg0: i32, %arg1: memref<8x256xf32, #tpu.memory_space<vmem>>, %arg2: memref<256x1024xbf16, #tpu.memory_space<vmem>>, %arg3: memref<1x1024xf32, #tpu.memory_space<vmem>>, %arg4: memref<1024x256xbf16, #tpu.memory_space<vmem>>, %arg5: memref<1x256xf32, #tpu.memory_space<vmem>>, %arg6: memref<256x64xbf16, #tpu.memory_space<vmem>>, %arg7: memref<1x64xf32, #tpu.memory_space<vmem>>, %arg8: memref<64x128xbf16, #tpu.memory_space<vmem>>, %arg9: memref<1x128xf32, #tpu.memory_space<vmem>>, %arg10: memref<128x128xbf16, #tpu.memory_space<vmem>>, %arg11: memref<1x128xf32, #tpu.memory_space<vmem>>, %arg12: memref<8x128xf32, #tpu.memory_space<vmem>>) attributes {dimension_semantics = [#tpu.dimension_semantics<parallel>], iteration_bounds = array<i64: 1>, scalar_prefetch = 0 : i64, scratch_operands = 0 : i64, tpu.core_type = #tpu.core_type<tc>, window_params = [{transform_indices = @transform_0, window_bounds = array<i64: 8, 256>}, {pipeline_mode = #tpu.pipeline_mode<synchronous>, transform_indices = @transform_1, window_bounds = array<i64: 256, 1024>}, {pipeline_mode = #tpu.pipeline_mode<synchronous>, transform_indices = @transform_2, window_bounds = array<i64: 1, 1024>}, {pipeline_mode = #tpu.pipeline_mode<synchronous>, transform_indices = @transform_3, window_bounds = array<i64: 1024, 256>}, {pipeline_mode = #tpu.pipeline_mode<synchronous>, transform_indices = @transform_4, window_bounds = array<i64: 1, 256>}, {pipeline_mode = #tpu.pipeline_mode<synchronous>, transform_indices = @transform_5, window_bounds = array<i64: 256, 64>}, {pipeline_mode = #tpu.pipeline_mode<synchronous>, transform_indices = @transform_6, window_bounds = array<i64: 1, 64>}, {pipeline_mode = #tpu.pipeline_mode<synchronous>, transform_indices = @transform_7, window_bounds = array<i64: 64, 128>}, {pipeline_mode = #tpu.pipeline_mode<synchronous>, transform_indices = @transform_8, window_bounds = array<i64: 1, 128>}, {pipeline_mode = #tpu.pipeline_mode<synchronous>, transform_indices = @transform_9, window_bounds = array<i64: 128, 128>}, {pipeline_mode = #tpu.pipeline_mode<synchronous>, transform_indices = @transform_10, window_bounds = array<i64: 1, 128>}, {transform_indices = @transform_11, window_bounds = array<i64: 8, 128>}]} {
    %c0 = arith.constant 0 : index
    %c0_0 = arith.constant 0 : index
    %0 = vector.load %arg1[%c0, %c0_0] : memref<8x256xf32, #tpu.memory_space<vmem>>, vector<8x256xf32>
    %1 = arith.truncf %0 : vector<8x256xf32> to vector<8x256xbf16>
    %c0_1 = arith.constant 0 : index
    %c0_2 = arith.constant 0 : index
    %2 = vector.load %arg2[%c0_1, %c0_2] : memref<256x1024xbf16, #tpu.memory_space<vmem>>, vector<256x1024xbf16>
    %cst = arith.constant dense<0.000000e+00> : vector<8x1024xf32>
    %3 = tpu.matmul %1, %2, %cst {dimension_numbers = #tpu.dot_dimension_numbers<[1], [0], [0], [1], [0, 0, 1, 1], [], []>} : vector<8x256xbf16>, vector<256x1024xbf16>, vector<8x1024xf32> -> vector<8x1024xf32>
    %c0_3 = arith.constant 0 : index
    %c0_4 = arith.constant 0 : index
    %4 = vector.load %arg3[%c0_3, %c0_4] : memref<1x1024xf32, #tpu.memory_space<vmem>>, vector<1x1024xf32>
    %5 = vector.broadcast %4 : vector<1x1024xf32> to vector<8x1024xf32>
    %6 = arith.addf %3, %5 : vector<8x1024xf32>
    %cst_5 = arith.constant 0.000000e+00 : f32
    %7 = vector.broadcast %cst_5 : f32 to vector<8x1024xf32>
    %8 = arith.maximumf %6, %7 : vector<8x1024xf32>
    %9 = arith.truncf %8 : vector<8x1024xf32> to vector<8x1024xbf16>
    %c0_6 = arith.constant 0 : index
    %c0_7 = arith.constant 0 : index
    %10 = vector.load %arg4[%c0_6, %c0_7] : memref<1024x256xbf16, #tpu.memory_space<vmem>>, vector<1024x256xbf16>
    %cst_8 = arith.constant dense<0.000000e+00> : vector<8x256xf32>
    %11 = tpu.matmul %9, %10, %cst_8 {dimension_numbers = #tpu.dot_dimension_numbers<[1], [0], [0], [1], [0, 0, 1, 1], [], []>} : vector<8x1024xbf16>, vector<1024x256xbf16>, vector<8x256xf32> -> vector<8x256xf32>
    %c0_9 = arith.constant 0 : index
    %c0_10 = arith.constant 0 : index
    %12 = vector.load %arg5[%c0_9, %c0_10] : memref<1x256xf32, #tpu.memory_space<vmem>>, vector<1x256xf32>
    %13 = vector.broadcast %12 : vector<1x256xf32> to vector<8x256xf32>
    %14 = arith.addf %11, %13 : vector<8x256xf32>
    %cst_11 = arith.constant 0.000000e+00 : f32
    %15 = vector.broadcast %cst_11 : f32 to vector<8x256xf32>
    %16 = arith.maximumf %14, %15 : vector<8x256xf32>
    %17 = arith.truncf %16 : vector<8x256xf32> to vector<8x256xbf16>
    %c0_12 = arith.constant 0 : index
    %c0_13 = arith.constant 0 : index
    %18 = vector.load %arg6[%c0_12, %c0_13] : memref<256x64xbf16, #tpu.memory_space<vmem>>, vector<256x64xbf16>
    %cst_14 = arith.constant dense<0.000000e+00> : vector<8x64xf32>
    %19 = tpu.matmul %17, %18, %cst_14 {dimension_numbers = #tpu.dot_dimension_numbers<[1], [0], [0], [1], [0, 0, 1, 1], [], []>} : vector<8x256xbf16>, vector<256x64xbf16>, vector<8x64xf32> -> vector<8x64xf32>
    %c0_15 = arith.constant 0 : index
    %c0_16 = arith.constant 0 : index
    %20 = vector.load %arg7[%c0_15, %c0_16] : memref<1x64xf32, #tpu.memory_space<vmem>>, vector<1x64xf32>
    %21 = vector.broadcast %20 : vector<1x64xf32> to vector<8x64xf32>
    %22 = arith.addf %19, %21 : vector<8x64xf32>
    %cst_17 = arith.constant 0.000000e+00 : f32
    %23 = vector.broadcast %cst_17 : f32 to vector<8x64xf32>
    %24 = arith.maximumf %22, %23 : vector<8x64xf32>
    %25 = arith.truncf %24 : vector<8x64xf32> to vector<8x64xbf16>
    %c0_18 = arith.constant 0 : index
    %c0_19 = arith.constant 0 : index
    %26 = vector.load %arg8[%c0_18, %c0_19] : memref<64x128xbf16, #tpu.memory_space<vmem>>, vector<64x128xbf16>
    %cst_20 = arith.constant dense<0.000000e+00> : vector<8x128xf32>
    %27 = tpu.matmul %25, %26, %cst_20 {dimension_numbers = #tpu.dot_dimension_numbers<[1], [0], [0], [1], [0, 0, 1, 1], [], []>} : vector<8x64xbf16>, vector<64x128xbf16>, vector<8x128xf32> -> vector<8x128xf32>
    %c0_21 = arith.constant 0 : index
    %c0_22 = arith.constant 0 : index
    %28 = vector.load %arg9[%c0_21, %c0_22] : memref<1x128xf32, #tpu.memory_space<vmem>>, vector<1x128xf32>
    %29 = vector.broadcast %28 : vector<1x128xf32> to vector<8x128xf32>
    %30 = arith.addf %27, %29 : vector<8x128xf32>
    %cst_23 = arith.constant 0.000000e+00 : f32
    %31 = vector.broadcast %cst_23 : f32 to vector<8x128xf32>
    %32 = arith.maximumf %30, %31 : vector<8x128xf32>
    %33 = arith.truncf %32 : vector<8x128xf32> to vector<8x128xbf16>
    %c0_24 = arith.constant 0 : index
    %c0_25 = arith.constant 0 : index
    %34 = vector.load %arg10[%c0_24, %c0_25] : memref<128x128xbf16, #tpu.memory_space<vmem>>, vector<128x128xbf16>
    %cst_26 = arith.constant dense<0.000000e+00> : vector<8x128xf32>
    %35 = tpu.matmul %33, %34, %cst_26 {dimension_numbers = #tpu.dot_dimension_numbers<[1], [0], [0], [1], [0, 0, 1, 1], [], []>} : vector<8x128xbf16>, vector<128x128xbf16>, vector<8x128xf32> -> vector<8x128xf32>
    %c0_27 = arith.constant 0 : index
    %c0_28 = arith.constant 0 : index
    %36 = vector.load %arg11[%c0_27, %c0_28] : memref<1x128xf32, #tpu.memory_space<vmem>>, vector<1x128xf32>
    %37 = vector.broadcast %36 : vector<1x128xf32> to vector<8x128xf32>
    %38 = arith.addf %35, %37 : vector<8x128xf32>
    %c0_29 = arith.constant 0 : index
    %c0_30 = arith.constant 0 : index
    %39 = vector.load %arg12[%c0_29, %c0_30] : memref<8x128xf32, #tpu.memory_space<vmem>>, vector<8x128xf32>
    tpu.vector_store %arg12[%c0_29, %c0_30], %38 {strides = array<i32>} : memref<8x128xf32, #tpu.memory_space<vmem>>, vector<8x128xf32>,
    return
  }
  func.func @transform_0(%arg0: i32) -> (i32, i32) {
    %c0_i32 = arith.constant 0 : i32
    %c0_i32_0 = arith.constant 0 : i32
    return %arg0, %c0_i32 : i32, i32
  }
  func.func @transform_1(%arg0: i32) -> (i32, i32) {
    %c0_i32 = arith.constant 0 : i32
    %c0_i32_0 = arith.constant 0 : i32
    %c0_i32_1 = arith.constant 0 : i32
    return %c0_i32, %c0_i32_0 : i32, i32
  }
  func.func @transform_2(%arg0: i32) -> (i32, i32) {
    %c0_i32 = arith.constant 0 : i32
    %c0_i32_0 = arith.constant 0 : i32
    %c0_i32_1 = arith.constant 0 : i32
    return %c0_i32, %c0_i32_0 : i32, i32
  }
  func.func @transform_3(%arg0: i32) -> (i32, i32) {
    %c0_i32 = arith.constant 0 : i32
    %c0_i32_0 = arith.constant 0 : i32
    %c0_i32_1 = arith.constant 0 : i32
    return %c0_i32, %c0_i32_0 : i32, i32
  }
  func.func @transform_4(%arg0: i32) -> (i32, i32) {
    %c0_i32 = arith.constant 0 : i32
    %c0_i32_0 = arith.constant 0 : i32
    %c0_i32_1 = arith.constant 0 : i32
    return %c0_i32, %c0_i32_0 : i32, i32
  }
  func.func @transform_5(%arg0: i32) -> (i32, i32) {
    %c0_i32 = arith.constant 0 : i32
    %c0_i32_0 = arith.constant 0 : i32
    %c0_i32_1 = arith.constant 0 : i32
    return %c0_i32, %c0_i32_0 : i32, i32
  }
  func.func @transform_6(%arg0: i32) -> (i32, i32) {
    %c0_i32 = arith.constant 0 : i32
    %c0_i32_0 = arith.constant 0 : i32
    %c0_i32_1 = arith.constant 0 : i32
    return %c0_i32, %c0_i32_0 : i32, i32
  }
  func.func @transform_7(%arg0: i32) -> (i32, i32) {
    %c0_i32 = arith.constant 0 : i32
    %c0_i32_0 = arith.constant 0 : i32
    %c0_i32_1 = arith.constant 0 : i32
    return %c0_i32, %c0_i32_0 : i32, i32
  }
  func.func @transform_8(%arg0: i32) -> (i32, i32) {
    %c0_i32 = arith.constant 0 : i32
    %c0_i32_0 = arith.constant 0 : i32
    %c0_i32_1 = arith.constant 0 : i32
    return %c0_i32, %c0_i32_0 : i32, i32
  }
  func.func @transform_9(%arg0: i32) -> (i32, i32) {
    %c0_i32 = arith.constant 0 : i32
    %c0_i32_0 = arith.constant 0 : i32
    %c0_i32_1 = arith.constant 0 : i32
    return %c0_i32, %c0_i32_0 : i32, i32
  }
  func.func @transform_10(%arg0: i32) -> (i32, i32) {
    %c0_i32 = arith.constant 0 : i32
    %c0_i32_0 = arith.constant 0 : i32
    %c0_i32_1 = arith.constant 0 : i32
    return %c0_i32, %c0_i32_0 : i32, i32
  }
  func.func @transform_11(%arg0: i32) -> (i32, i32) {
    %c0_i32 = arith.constant 0 : i32
    %c0_i32_0 = arith.constant 0 : i32
    return %arg0, %c0_i32 : i32, i32
  }
}

</mosaic_0001>

<bundles_post_ra>
// kernel: cnn_forward.1
= control target key start
LH: loop header
LB: loop body
LE: loop exit
PB: predicated region body
PF: predicated region fallthrough
CT: control target
= control target key end

     0   :  { %16 = vsyncpa [#allocation3], 0  ;;  %s3283_s0 = inlined_call_operand.vmem [shape: f32[8,256], index: 0, kind: input, shape index: {}]   ;;  %s3284_s1 = inlined_call_operand.hbm [shape: bf16[256,1024], index: 1, kind: input, shape index: {}]   ;;  %s3285_s2 = inlined_call_operand.vmem [shape: f32[1,1024], index: 2, kind: input, shape index: {}]   ;;  %s3286_s3 = inlined_call_operand.hbm [shape: bf16[1024,256], index: 3, kind: input, shape index: {}]   ;;  %s3287_s4 = inlined_call_operand.vmem [shape: f32[1,256], index: 4, kind: input, shape index: {}]   ;;  %s3288_s5 = inlined_call_operand.vmem [shape: bf16[256,64], index: 5, kind: input, shape index: {}]   ;;  %s3289_s6 = inlined_call_operand.vmem [shape: f32[1,64], index: 6, kind: input, shape index: {}]   ;;  %s3290_s7 = inlined_call_operand.vmem [shape: bf16[64,128], index: 7, kind: input, shape index: {}]   ;;  %s3291_s8 = inlined_call_operand.vmem [shape: f32[1,128], index: 8, kind: input, shape index: {}]   ;;  %s3292_s9 = inlined_call_operand.vmem [shape: bf16[128,128], index: 9, kind: input, shape index: {}]   ;;  %s3293_s10 = inlined_call_operand.vmem [shape: f32[1,128], index: 10, kind: input, shape index: {}]   ;;  %s3294_s11 = inlined_call_operand.vmem [shape: f32[8,128], index: 11, kind: output, shape index: {}]  }
   0x1   :  { %17 = vsyncpa [#allocation5], 0  ;;  %s3035_s17 = smov [#allocation2]   ;;  %s2987_s21 = scalar_lea.hbm %s3284_s1, 16384 }
   0x2   :  { %s25_s18 = sshll.u32 %s3035_s17, 4  ;;  %p2988_p0 = scmp.ne.s32.totalorder %s3284_s1, %s2987_s21  ;;  %s26_s18 = int_to_ptr.vmem [resolvable:$true] %s25_s18 }
   0x3   :  { %p2991_p1 = scmp.lt.u32.totalorder %s2987_s21, %s3284_s1 }
   0x5   :  { %p2993_p2 = pnand %p2991_p1, %p2988_p0 }
   0x7   :  { %2996 = shalt.err (!%p2993_p2)
}
   0x8   :  { %s2997_s26 = scalar_lea.vmem %s26_s18, 16384  ;;  %p3002_p4 = scmp.lt.s32.totalorder %s26_s18, %s26_s18 }
   0x9   :  { %p2998_p3 = scmp.ne.s32.totalorder %s26_s18, %s2997_s26  ;;  %p3003_p5 = scmp.lt.s32.totalorder %s2997_s26, %s2997_s26 }
   0xb   :  { %p3004_p6 = por %p3003_p5, %p3002_p4 }
   0xd   :  { %p3005_p7 = pnand %p3004_p6, %p2998_p3 }
   0xf   :  { %3008 = shalt.err (!%p3005_p7)
}
  0x10   :  { %s3036_s27 = smov 512   ;;  %s3037_s28 = smov 32  }
  0x11   :  { %31 = dma.hbm_to_vmem [thread:$0]  %s3284_s1, 16384, %s26_s18, [#allocation3], %s3036_s27, %s3036_s27, %s3037_s28  }
  0x12   :  { %s3038_s12 = smov [#allocation4]   ;;  %s3009_s16 = scalar_lea.hbm %s3286_s3, 16384 }
  0x13   :  { %s39_s13 = sshll.u32 %s3038_s12, 4  ;;  %p3010_p8 = scmp.ne.s32.totalorder %s3286_s3, %s3009_s16  ;;  %s40_s13 = int_to_ptr.vmem [resolvable:$true] %s39_s13 }
  0x14   :  { %p3013_p9 = scmp.lt.u32.totalorder %s3009_s16, %s3286_s3 }
  0x16   :  { %p3015_p10 = pnand %p3013_p9, %p3010_p8 }
  0x18   :  { %3018 = shalt.err (!%p3015_p10)
}
  0x19   :  { %s3019_s22 = scalar_lea.vmem %s40_s13, 16384  ;;  %p3024_p12 = scmp.lt.s32.totalorder %s40_s13, %s40_s13 }
  0x1a   :  { %p3020_p11 = scmp.ne.s32.totalorder %s40_s13, %s3019_s22  ;;  %p3025_p13 = scmp.lt.s32.totalorder %s3019_s22, %s3019_s22 }
  0x1c   :  { %p3026_p0 = por %p3025_p13, %p3024_p12 }
  0x1e   :  { %p3027_p1 = pnand %p3026_p0, %p3020_p11 }
  0x20   :  { %3030 = shalt.err (!%p3027_p1)
}
  0x21   :  { %s3039_s1 = smov 128   ;;  %s3040_s18 = smov 8  }
  0x22   :  { %45 = dma.hbm_to_vmem [thread:$0]  %s3286_s3, 16384, %s40_s13, [#allocation5], %s3039_s1, %s3039_s1, %s3040_s18  }
  0x23   :  { %3031 = dma.done.wait [#allocation3], 16384  }
  0x24   :  { %3032 = vsyncadd [#allocation3], 4294950912 }
  0x25   :  { %3033 = dma.done.wait [#allocation5], 16384  }
  0x26   :  { %3034 = vsyncadd [#allocation5], 4294950912  ;;  %v71_v0 = vld [vmem:[#allocation2] sm:$0xff]  ;;  %v68_v17 = vld [vmem:[%s3283_s0 + $0x8] sm:$0xff]  ;;  %vm3042_vm0 = vmmov 0   ;;  %vm2225_vm1 = vcmask 523264  }
  0x27   :  { %v75_v1 = vld [vmem:[#allocation2 + $0x20] sm:$0xff]  ;;  %v3130_v18 = vpack.c.bf16 %v68_v17, %v68_v17  ;;  %v73_v31 = vld [vmem:[#allocation2 + $0x10] sm:$0xff] }
  0x28   :  { %v79_v2 = vld [vmem:[#allocation2 + $0x40] sm:$0xff]  ;;  %v2390_v3 = vcombine.high %v71_v0, %v75_v1  ;;  %v2389_v4 = vcombine.low %v71_v0, %v75_v1  ;;  %v77_v32 = vld [vmem:[#allocation2 + $0x30] sm:$0xff] }
  0x29   :  { %v83_v5 = vld [vmem:[#allocation2 + $0x60] sm:$0xff]  ;;  %913 = vmatprep.mubr.bf16.mxu1 %v3130_v18  ;;  %995 = vmatprep.mubr.bf16.mxu0 %v3130_v18  ;;  %v81_v33 = vld [vmem:[#allocation2 + $0x50] sm:$0xff]  ;;  %v2394_v34 = vcombine.high %v73_v31, %v77_v32  ;;  %v2393_v35 = vcombine.low %v73_v31, %v77_v32 }
  0x2a   :  { %v2398_v6 = vcombine.high %v79_v2, %v83_v5  ;;  %v87_v7 = vld [vmem:[#allocation2 + $0x80] sm:$0xff]  ;;  %881 = vmatprep.subr.bf16.mxu1 %v2390_v3  ;;  %v2397_v9 = vcombine.low %v79_v2, %v83_v5  ;;  %v85_v36 = vld [vmem:[#allocation2 + $0x70] sm:$0xff] }
  0x2b   :  { %v91_v8 = vld [vmem:[#allocation2 + $0xa0] sm:$0xff]  ;;  %882 = vmatpush1.bf16.msra.mxu1 %v2389_v4  ;;  %v2402_v38 = vcombine.high %v81_v33, %v85_v36  ;;  %v89_v39 = vld [vmem:[#allocation2 + $0x90] sm:$0xff]  ;;  %963 = vmatprep.subr.bf16.mxu0 %v2394_v34  ;;  %v2401_v44 = vcombine.low %v81_v33, %v85_v36 }
  0x2c   :  { %883 = vmatprep.subr.bf16.mxu1 %v2398_v6  ;;  %v2406_v10 = vcombine.high %v87_v7, %v91_v8  ;;  %v95_v11 = vld [vmem:[#allocation2 + $0xc0] sm:$0xff]  ;;  %v2405_v13 = vcombine.low %v87_v7, %v91_v8  ;;  %v93_v40 = vld [vmem:[#allocation2 + $0xb0] sm:$0xff]  ;;  %964 = vmatpush1.bf16.msra.mxu0 %v2393_v35 }
  0x2d   :  { %v99_v12 = vld [vmem:[#allocation2 + $0xe0] sm:$0xff]  ;;  %965 = vmatprep.subr.bf16.mxu0 %v2402_v38  ;;  %v2410_v45 = vcombine.high %v89_v39, %v93_v40  ;;  %v97_v47 = vld [vmem:[#allocation2 + $0xd0] sm:$0xff]  ;;  %v2409_v52 = vcombine.low %v89_v39, %v93_v40  ;;  %v72_v40 = vld [vmem:[#allocation2 + $0x8] sm:$0xff] }
  0x2e   :  { %v2414_v14 = vcombine.high %v95_v11, %v99_v12  ;;  %v103_v15 = vld [vmem:[#allocation2 + $0x100] sm:$0xff]  ;;  %v2413_v19 = vcombine.low %v95_v11, %v99_v12  ;;  %v101_v48 = vld [vmem:[#allocation2 + $0xf0] sm:$0xff] }
  0x2f   :  { %884 = vmatpush1.bf16.msra.mxu1 %v2397_v9  ;;  %v107_v16 = vld [vmem:[#allocation2 + $0x120] sm:$0xff]  ;;  %v2418_v53 = vcombine.high %v97_v47, %v101_v48  ;;  %v105_v55 = vld [vmem:[#allocation2 + $0x110] sm:$0xff]  ;;  %v2417_v60 = vcombine.low %v97_v47, %v101_v48 }
  0x30   :  { %885 = vmatprep.subr.bf16.mxu1 %v2406_v10  ;;  %v2422_v20 = vcombine.high %v103_v15, %v107_v16  ;;  %v111_v21 = vld [vmem:[#allocation2 + $0x140] sm:$0xff]  ;;  %v2421_v23 = vcombine.low %v103_v15, %v107_v16  ;;  %966 = vmatpush1.bf16.msra.mxu0 %v2401_v44  ;;  %v109_v56 = vld [vmem:[#allocation2 + $0x130] sm:$0xff]  ;;  %v76_v44 = vld [vmem:[#allocation2 + $0x28] sm:$0xff] }
  0x31   :  { %v115_v22 = vld [vmem:[#allocation2 + $0x160] sm:$0xff]  ;;  %967 = vmatprep.subr.bf16.mxu0 %v2410_v45  ;;  %v2426_v61 = vcombine.high %v105_v55, %v109_v56  ;;  %v113_v63 = vld [vmem:[#allocation2 + $0x150] sm:$0xff]  ;;  %v2425_v4 = vcombine.low %v105_v55, %v109_v56 }
  0x32   :  { %v2430_v24 = vcombine.high %v111_v21, %v115_v22  ;;  %v119_v25 = vld [vmem:[#allocation2 + $0x180] sm:$0xff]  ;;  %v2429_v27 = vcombine.low %v111_v21, %v115_v22  ;;  %v117_v0 = vld [vmem:[#allocation2 + $0x170] sm:$0xff] }
  0x33   :  { %886 = vmatpush1.bf16.msra.mxu1 %v2405_v13  ;;  %v123_v26 = vld [vmem:[#allocation2 + $0x1a0] sm:$0xff]  ;;  %v2434_v5 = vcombine.high %v113_v63, %v117_v0  ;;  %v121_v6 = vld [vmem:[#allocation2 + $0x190] sm:$0xff]  ;;  %v2433_v12 = vcombine.low %v113_v63, %v117_v0 }
  0x34   :  { %887 = vmatprep.subr.bf16.mxu1 %v2414_v14  ;;  %v2438_v28 = vcombine.high %v119_v25, %v123_v26  ;;  %v127_v29 = vld [vmem:[#allocation2 + $0x1c0] sm:$0xff]  ;;  %v2437_v37 = vcombine.low %v119_v25, %v123_v26  ;;  %968 = vmatpush1.bf16.msra.mxu0 %v2409_v52  ;;  %v125_v8 = vld [vmem:[#allocation2 + $0x1b0] sm:$0xff]  ;;  %v2392_v52 = vcombine.high %v72_v40, %v76_v44 }
  0x35   :  { %v131_v30 = vld [vmem:[#allocation2 + $0x1e0] sm:$0xff]  ;;  %969 = vmatprep.subr.bf16.mxu0 %v2418_v53  ;;  %v2442_v13 = vcombine.high %v121_v6, %v125_v8  ;;  %v129_v14 = vld [vmem:[#allocation2 + $0x1d0] sm:$0xff]  ;;  %v2441_v21 = vcombine.low %v121_v6, %v125_v8  ;;  %v84_v53 = vld [vmem:[#allocation2 + $0x68] sm:$0xff] }
  0x36   :  { %v2446_v41 = vcombine.high %v127_v29, %v131_v30  ;;  %v135_v42 = vld [vmem:[#allocation2 + $0x200] sm:$0xff]  ;;  %v2445_v46 = vcombine.low %v127_v29, %v131_v30  ;;  %v133_v16 = vld [vmem:[#allocation2 + $0x1f0] sm:$0xff]  ;;  %v100_v6 = vld [vmem:[#allocation2 + $0xe8] sm:$0xff] }
  0x37   :  { %888 = vmatpush1.bf16.msra.mxu1 %v2413_v19  ;;  %v139_v43 = vld [vmem:[#allocation2 + $0x220] sm:$0xff]  ;;  %v2450_v22 = vcombine.high %v129_v14, %v133_v16  ;;  %v137_v25 = vld [vmem:[#allocation2 + $0x210] sm:$0xff]  ;;  %v2449_v29 = vcombine.low %v129_v14, %v133_v16 }
  0x38   :  { %889 = vmatprep.subr.bf16.mxu1 %v2422_v20  ;;  %v2454_v49 = vcombine.high %v135_v42, %v139_v43  ;;  %v143_v50 = vld [vmem:[#allocation2 + $0x240] sm:$0xff]  ;;  %v2453_v54 = vcombine.low %v135_v42, %v139_v43  ;;  %970 = vmatpush1.bf16.msra.mxu0 %v2417_v60  ;;  %v141_v26 = vld [vmem:[#allocation2 + $0x230] sm:$0xff] }
  0x39   :  { %v147_v51 = vld [vmem:[#allocation2 + $0x260] sm:$0xff]  ;;  %971 = vmatprep.subr.bf16.mxu0 %v2426_v61  ;;  %v2458_v30 = vcombine.high %v137_v25, %v141_v26  ;;  %v145_v33 = vld [vmem:[#allocation2 + $0x250] sm:$0xff] }
  0x3a   :  { %v2462_v57 = vcombine.high %v143_v50, %v147_v51  ;;  %v151_v58 = vld [vmem:[#allocation2 + $0x280] sm:$0xff]  ;;  %v2461_v62 = vcombine.low %v143_v50, %v147_v51  ;;  %v149_v34 = vld [vmem:[#allocation2 + $0x270] sm:$0xff] }
  0x3b   :  { %890 = vmatpush1.bf16.msra.mxu1 %v2421_v23  ;;  %v155_v59 = vld [vmem:[#allocation2 + $0x2a0] sm:$0xff]  ;;  %v2466_v38 = vcombine.high %v145_v33, %v149_v34  ;;  %v157_v42 = vld [vmem:[#allocation2 + $0x2b0] sm:$0xff] }
  0x3c   :  { %891 = vmatprep.subr.bf16.mxu1 %v2430_v24  ;;  %v2470_v1 = vcombine.high %v151_v58, %v155_v59  ;;  %v159_v2 = vld [vmem:[#allocation2 + $0x2c0] sm:$0xff]  ;;  %v2469_v7 = vcombine.low %v151_v58, %v155_v59  ;;  %972 = vmatpush1.bf16.msra.mxu0 %v2425_v4  ;;  %v161_v50 = vld [vmem:[#allocation2 + $0x2d0] sm:$0xff]  ;;  %v88_v58 = vld [vmem:[#allocation2 + $0x88] sm:$0xff] }
  0x3d   :  { %v163_v3 = vld [vmem:[#allocation2 + $0x2e0] sm:$0xff]  ;;  %973 = vmatprep.subr.bf16.mxu0 %v2434_v5  ;;  %v165_v51 = vld [vmem:[#allocation2 + $0x2f0] sm:$0xff]  ;;  %v92_v59 = vld [vmem:[#allocation2 + $0xa8] sm:$0xff] }
  0x3e   :  { %v2478_v9 = vcombine.high %v159_v2, %v163_v3  ;;  %v167_v10 = vld [vmem:[#allocation2 + $0x300] sm:$0xff]  ;;  %v2477_v15 = vcombine.low %v159_v2, %v163_v3  ;;  %v2482_v56 = vcombine.high %v161_v50, %v165_v51  ;;  %v169_v60 = vld [vmem:[#allocation2 + $0x310] sm:$0xff]  ;;  %v2481_v63 = vcombine.low %v161_v50, %v165_v51  ;;  %v96_v5 = vld [vmem:[#allocation2 + $0xc8] sm:$0xff] }
  0x3f   :  { %892 = vmatpush1.bf16.msra.mxu1 %v2429_v27  ;;  %v171_v11 = vld [vmem:[#allocation2 + $0x320] sm:$0xff]  ;;  %v173_v61 = vld [vmem:[#allocation2 + $0x330] sm:$0xff]  ;;  %v2408_v4 = vcombine.high %v88_v58, %v92_v59  ;;  %v2416_v14 = vcombine.high %v96_v5, %v100_v6  ;;  %v152_v51 = vld [vmem:[#allocation2 + $0x288] sm:$0xff] }
  0x40   :  { %893 = vmatprep.subr.bf16.mxu1 %v2438_v28  ;;  %v2486_v17 = vcombine.high %v167_v10, %v171_v11  ;;  %v175_v19 = vld [vmem:[#allocation2 + $0x340] sm:$0xff]  ;;  %974 = vmatpush1.bf16.msra.mxu0 %v2433_v12  ;;  %v2485_v23 = vcombine.low %v167_v10, %v171_v11  ;;  %v2490_v0 = vcombine.high %v169_v60, %v173_v61  ;;  %v177_v2 = vld [vmem:[#allocation2 + $0x350] sm:$0xff]  ;;  %v104_v12 = vld [vmem:[#allocation2 + $0x108] sm:$0xff] }
  0x41   :  { %v179_v20 = vld [vmem:[#allocation2 + $0x360] sm:$0xff]  ;;  %975 = vmatprep.subr.bf16.mxu0 %v2442_v13  ;;  %v181_v3 = vld [vmem:[#allocation2 + $0x370] sm:$0xff]  ;;  %v2407_v11 = vcombine.low %v88_v58, %v92_v59  ;;  %v108_v13 = vld [vmem:[#allocation2 + $0x128] sm:$0xff] }
  0x42   :  { %v183_v24 = vld [vmem:[#allocation2 + $0x380] sm:$0xff]  ;;  %v2494_v27 = vcombine.high %v175_v19, %v179_v20  ;;  %v2493_v31 = vcombine.low %v175_v19, %v179_v20  ;;  %v185_v8 = vld [vmem:[#allocation2 + $0x390] sm:$0xff]  ;;  %v2498_v10 = vcombine.high %v177_v2, %v181_v3  ;;  %v2415_v20 = vcombine.low %v96_v5, %v100_v6  ;;  %v160_v58 = vld [vmem:[#allocation2 + $0x2c8] sm:$0xff] }
  0x43   :  { %894 = vmatpush1.bf16.msra.mxu1 %v2437_v37  ;;  %v187_v28 = vld [vmem:[#allocation2 + $0x3a0] sm:$0xff]  ;;  %v2457_v37 = vcombine.low %v137_v25, %v141_v26  ;;  %v193_v16 = vld [vmem:[#allocation2 + $0x3d0] sm:$0xff]  ;;  %v2423_v26 = vcombine.low %v104_v12, %v108_v13  ;;  %v164_v59 = vld [vmem:[#allocation2 + $0x2e8] sm:$0xff] }
  0x44   :  { %895 = vmatprep.subr.bf16.mxu1 %v2446_v41  ;;  %976 = vmatpush1.bf16.msra.mxu0 %v2441_v21  ;;  %v191_v32 = vld [vmem:[#allocation2 + $0x3c0] sm:$0xff]  ;;  %v2502_v35 = vcombine.high %v183_v24, %v187_v28  ;;  %v2501_v39 = vcombine.low %v183_v24, %v187_v28  ;;  %v153_v41 = vld [vmem:[#allocation2 + $0x290] sm:$0xff]  ;;  %v112_v21 = vld [vmem:[#allocation2 + $0x148] sm:$0xff]  ;;  %v2479_v5 = vcombine.low %v160_v58, %v164_v59 }
  0x45   :  { %977 = vmatprep.subr.bf16.mxu0 %v2450_v22  ;;  %v195_v36 = vld [vmem:[#allocation2 + $0x3e0] sm:$0xff]  ;;  %v2474_v47 = vcombine.high %v153_v41, %v157_v42  ;;  %v116_v22 = vld [vmem:[#allocation2 + $0x168] sm:$0xff] }
  0x46   :  { %v2510_v43 = vcombine.high %v191_v32, %v195_v36  ;;  %v67_v45 = vld [vmem:[%s3283_s0] sm:$0xff]  ;;  %v2509_v48 = vcombine.low %v191_v32, %v195_v36  ;;  %v124_v28 = vld [vmem:[#allocation2 + $0x1a8] sm:$0xff]  ;;  %v2431_v32 = vcombine.low %v112_v21, %v116_v22 }
  0x47   :  { %896 = vmatpush1.bf16.msra.mxu1 %v2445_v46  ;;  %v2465_v46 = vcombine.low %v145_v33, %v149_v34  ;;  %v3137_v55 = vpack.c.bf16 %v67_v45, %v67_v45  ;;  %v128_v33 = vld [vmem:[#allocation2 + $0x1c8] sm:$0xff] }
  0x48   :  { %897 = vmatprep.subr.bf16.mxu1 %v2454_v49  ;;  %978 = vmatpush1.bf16.msra.mxu0 %v2449_v29  ;;  %v80_v49 = vld [vmem:[#allocation2 + $0x48] sm:$0xff]  ;;  %v2432_v29 = vcombine.high %v112_v21, %v116_v22 }
  0x49   :  { %979 = vmatprep.subr.bf16.mxu0 %v2458_v30  ;;  %v2769_v30 = vld [vmem:[#allocation4 + $0x4] ss:$8 sps:$4 sm:$0xff]   ;;  %v2791_v22 = vld [vmem:[#allocation4 + $0x80] ss:$8 sps:$4 sm:$0xff]  }
  0x4a   :  { %v132_v34 = vld [vmem:[#allocation2 + $0x1e8] sm:$0xff] }
  0x4b   :  { %898 = vmatpush1.bf16.msra.mxu1 %v2453_v54  ;;  %v2473_v54 = vcombine.low %v153_v41, %v157_v42  ;;  %v2770_v41 = vld [vmem:[#allocation4 + $0x10] ss:$8 sps:$4 sm:$0xff]   ;;  %v2448_v42 = vcombine.high %v128_v33, %v132_v34  ;;  %v144_v45 = vld [vmem:[#allocation2 + $0x248] sm:$0xff] }
  0x4c   :  { %899 = vmatprep.subr.bf16.mxu1 %v2462_v57  ;;  %980 = vmatpush1.bf16.msra.mxu0 %v2457_v37  ;;  %v2391_v57 = vcombine.low %v72_v40, %v76_v44  ;;  %v2772_v37 = vld [vmem:[#allocation4 + $0x14] ss:$8 sps:$4 sm:$0xff]   ;;  %v140_v40 = vld [vmem:[#allocation2 + $0x228] sm:$0xff]  ;;  %v2447_v44 = vcombine.low %v128_v33, %v132_v34 }
  0x4d   :  { %981 = vmatprep.subr.bf16.mxu0 %v2466_v38  ;;  %v176_v6 = vld [vmem:[#allocation2 + $0x348] sm:$0xff]  ;;  %v86_v33 = vld [vmem:[#allocation2 + $0x78] sm:$0xff] }
  0x4e   :  { %v196_v21 = vld [vmem:[#allocation2 + $0x3e8] sm:$0xff] }
  0x4f   :  { %900 = vmatpush1.bf16.msra.mxu1 %v2461_v62  ;;  %v2400_v62 = vcombine.high %v80_v49, %v84_v53  ;;  %v2797_v34 = vld [vmem:[#allocation4 + $0xa0] ss:$8 sps:$4 sm:$0xff]  }
  0x50   :  { %901 = vmatprep.subr.bf16.mxu1 %v2470_v1  ;;  %982 = vmatpush1.bf16.msra.mxu0 %v2465_v46  ;;  %v2399_v1 = vcombine.low %v80_v49, %v84_v53  ;;  %v148_v46 = vld [vmem:[#allocation2 + $0x268] sm:$0xff]  ;;  %v2778_v49 = vld [vmem:[#allocation4 + $0x34] ss:$8 sps:$4 sm:$0xff]   ;;  %v2776_v53 = vld [vmem:[#allocation4 + $0x30] ss:$8 sps:$4 sm:$0xff]  }
  0x51   :  { %983 = vmatprep.subr.bf16.mxu0 %v2474_v47  ;;  %v2773_v47 = vld [vmem:[#allocation4 + $0x20] ss:$8 sps:$4 sm:$0xff]  }
  0x53   :  { %902 = vmatpush1.bf16.msra.mxu1 %v2469_v7  ;;  %v2489_v7 = vcombine.low %v169_v60, %v173_v61  ;;  %v2779_v60 = vld [vmem:[#allocation4 + $0x40] ss:$8 sps:$4 sm:$0xff]  }
  0x54   :  { %903 = vmatprep.subr.bf16.mxu1 %v2478_v9  ;;  %984 = vmatpush1.bf16.msra.mxu0 %v2473_v54  ;;  %v189_v9 = vld [vmem:[#allocation2 + $0x3b0] sm:$0xff]  ;;  %v2464_v54 = vcombine.high %v144_v45, %v148_v46 }
  0x55   :  { %985 = vmatprep.subr.bf16.mxu0 %v2482_v56  ;;  %v2506_v19 = vcombine.high %v185_v8, %v189_v9  ;;  %v2505_v24 = vcombine.low %v185_v8, %v189_v9  ;;  %v2781_v56 = vld [vmem:[#allocation4 + $0x44] ss:$8 sps:$4 sm:$0xff]   ;;  %v2785_v8 = vld [vmem:[#allocation4 + $0x60] ss:$8 sps:$4 sm:$0xff]  }
  0x57   :  { %904 = vmatpush1.bf16.msra.mxu1 %v2477_v15  ;;  %v2497_v15 = vcombine.low %v177_v2, %v181_v3  ;;  %v2782_v2 = vld [vmem:[#allocation4 + $0x50] ss:$8 sps:$4 sm:$0xff]   ;;  %v2480_v3 = vcombine.high %v160_v58, %v164_v59 }
  0x58   :  { %905 = vmatprep.subr.bf16.mxu1 %v2486_v17  ;;  %986 = vmatpush1.bf16.msra.mxu0 %v2481_v63  ;;  %v197_v17 = vld [vmem:[#allocation2 + $0x3f0] sm:$0xff]  ;;  %v122_v59 = vld [vmem:[#allocation2 + $0x198] sm:$0xff] }
  0x59   :  { %987 = vmatprep.subr.bf16.mxu0 %v2490_v0  ;;  %v2514_v25 = vcombine.high %v193_v16, %v197_v17  ;;  %v168_v0 = vld [vmem:[#allocation2 + $0x308] sm:$0xff] }
  0x5b   :  { %906 = vmatpush1.bf16.msra.mxu1 %v2485_v23  ;;  %v2424_v23 = vcombine.high %v104_v12, %v108_v13  ;;  %v184_v12 = vld [vmem:[#allocation2 + $0x388] sm:$0xff] }
  0x5c   :  { %907 = vmatprep.subr.bf16.mxu1 %v2494_v27  ;;  %988 = vmatpush1.bf16.msra.mxu0 %v2489_v7  ;;  %v120_v27 = vld [vmem:[#allocation2 + $0x188] sm:$0xff] }
  0x5d   :  { %989 = vmatprep.subr.bf16.mxu0 %v2498_v10  ;;  %v2440_v36 = vcombine.high %v120_v27, %v124_v28  ;;  %v2439_v38 = vcombine.low %v120_v27, %v124_v28  ;;  %v180_v7 = vld [vmem:[#allocation2 + $0x368] sm:$0xff]  ;;  %v2790_v10 = vld [vmem:[#allocation4 + $0x74] ss:$8 sps:$4 sm:$0xff]   ;;  %v2794_v28 = vld [vmem:[#allocation4 + $0x90] ss:$8 sps:$4 sm:$0xff]  }
  0x5e   :  { %v2496_v13 = vcombine.high %v176_v6, %v180_v7  ;;  %v78_v27 = vld [vmem:[#allocation2 + $0x38] sm:$0xff] }
  0x5f   :  { %908 = vmatpush1.bf16.msra.mxu1 %v2493_v31  ;;  %v2513_v31 = vcombine.low %v193_v16, %v197_v17  ;;  %v2793_v16 = vld [vmem:[#allocation4 + $0x84] ss:$8 sps:$4 sm:$0xff]   ;;  %v2495_v17 = vcombine.low %v176_v6, %v180_v7  ;;  %v2812_v6 = vld [vmem:[#allocation4 + $0xf0] ss:$8 sps:$4 sm:$0xff]  }
  0x60   :  { %909 = vmatprep.subr.bf16.mxu1 %v2502_v35  ;;  %990 = vmatpush1.bf16.msra.mxu0 %v2497_v15  ;;  %v2767_v35 = vld [vmem:[#allocation4] ss:$8 sps:$4 sm:$0xff]   ;;  %v2788_v15 = vld [vmem:[#allocation4 + $0x70] ss:$8 sps:$4 sm:$0xff]  }
  0x61   :  { %991 = vmatprep.subr.bf16.mxu0 %v2506_v19  ;;  %v138_v7 = vld [vmem:[#allocation2 + $0x218] sm:$0xff] }
  0x63   :  { %910 = vmatpush1.bf16.msra.mxu1 %v2501_v39  ;;  %v136_v39 = vld [vmem:[#allocation2 + $0x208] sm:$0xff] }
  0x64   :  { %911 = vmatprep.subr.bf16.mxu1 %v2510_v43  ;;  %992 = vmatpush1.bf16.msra.mxu0 %v2505_v24  ;;  %v2775_v43 = vld [vmem:[#allocation4 + $0x24] ss:$8 sps:$4 sm:$0xff]   ;;  %v2455_v50 = vcombine.low %v136_v39, %v140_v40 }
  0x65   :  { %993 = vmatprep.subr.bf16.mxu0 %v2514_v25 }
  0x67   :  { %912 = vmatpush1.bf16.msra.mxu1 %v2509_v48  ;;  %v2456_v48 = vcombine.high %v136_v39, %v140_v40  ;;  %v94_v39 = vld [vmem:[#allocation2 + $0xb8] sm:$0xff] }
  0x68   :  { %922 = vmatprep.subr.bf16.mxu1 %v2392_v52  ;;  %994 = vmatpush1.bf16.msra.mxu0 %v2513_v31  ;;  %v156_v52 = vld [vmem:[#allocation2 + $0x2a8] sm:$0xff]  ;;  %v2800_v40 = vld [vmem:[#allocation4 + $0xb0] ss:$8 sps:$4 sm:$0xff]  }
  0x69   :  { %1841 = vmatprep.subr.bf16.mxu0 %v2769_v30  ;;  %v2472_v61 = vcombine.high %v152_v51, %v156_v52  ;;  %v2471_v63 = vcombine.low %v152_v51, %v156_v52  ;;  %v110_v51 = vld [vmem:[#allocation2 + $0x138] sm:$0xff] }
  0x6a   :  { %914 = vmatmul.mubr.bf16.vlgmr.msra.gmra.mrb[0].mxu1 %v3137_v55  ;;  %v2806_v52 = vld [vmem:[#allocation4 + $0xd0] ss:$8 sps:$4 sm:$0xff]  }
  0x6b   :  { %923 = vmatpush1.bf16.msra.mxu1 %v2391_v57  ;;  %954 = vmatprep.mubr.bf16.mxu1 %v3130_v18  ;;  %v2463_v57 = vcombine.low %v144_v45, %v148_v46  ;;  %v102_v45 = vld [vmem:[#allocation2 + $0xf8] sm:$0xff]  ;;  %v2803_v46 = vld [vmem:[#allocation4 + $0xc0] ss:$8 sps:$4 sm:$0xff]  }
  0x6c   :  { %924 = vmatprep.subr.bf16.mxu1 %v2400_v62  ;;  %996 = vmatmul.mubr.bf16.vlgmr.msra.gmra.mrb[0].mxu0 %v3137_v55  ;;  %v2784_v62 = vld [vmem:[#allocation4 + $0x54] ss:$8 sps:$4 sm:$0xff]  }
  0x6d   :  { %1842 = vmatpush1.bf16.msra.mxu0 %v2767_v35  ;;  %v2802_v35 = vld [vmem:[#allocation4 + $0xb4] ss:$8 sps:$4 sm:$0xff]  }
  0x6e   :  { %1843 = vmatprep.subr.bf16.mxu0 %v2772_v37 }
  0x6f   :  { %925 = vmatpush1.bf16.msra.mxu1 %v2399_v1  ;;  %v172_v1 = vld [vmem:[#allocation2 + $0x328] sm:$0xff] }
  0x70   :  { %926 = vmatprep.subr.bf16.mxu1 %v2408_v4  ;;  %v2787_v4 = vld [vmem:[#allocation4 + $0x64] ss:$8 sps:$4 sm:$0xff]   ;;  %v2488_v9 = vcombine.high %v168_v0, %v172_v1 }
  0x71   :  { %1844 = vmatpush1.bf16.msra.mxu0 %v2770_v41  ;;  %v2805_v41 = vld [vmem:[#allocation4 + $0xc4] ss:$8 sps:$4 sm:$0xff]  }
  0x72   :  { %1845 = vmatprep.subr.bf16.mxu0 %v2775_v43 }
  0x73   :  { %927 = vmatpush1.bf16.msra.mxu1 %v2407_v11  ;;  %v2487_v11 = vcombine.low %v168_v0, %v172_v1  ;;  %v2809_v0 = vld [vmem:[#allocation4 + $0xe0] ss:$8 sps:$4 sm:$0xff]   ;;  %v130_v1 = vld [vmem:[#allocation2 + $0x1d8] sm:$0xff] }
  0x74   :  { %928 = vmatprep.subr.bf16.mxu1 %v2416_v14  ;;  %v188_v14 = vld [vmem:[#allocation2 + $0x3a8] sm:$0xff] }
  0x75   :  { %1846 = vmatpush1.bf16.msra.mxu0 %v2773_v47  ;;  %v2504_v19 = vcombine.high %v184_v12, %v188_v14  ;;  %v2503_v24 = vcombine.low %v184_v12, %v188_v14  ;;  %v2808_v47 = vld [vmem:[#allocation4 + $0xd4] ss:$8 sps:$4 sm:$0xff]  }
  0x76   :  { %1847 = vmatprep.subr.bf16.mxu0 %v2778_v49  ;;  %v146_v12 = vld [vmem:[#allocation2 + $0x258] sm:$0xff] }
  0x77   :  { %929 = vmatpush1.bf16.msra.mxu1 %v2415_v20  ;;  %v192_v20 = vld [vmem:[#allocation2 + $0x3c8] sm:$0xff] }
  0x78   :  { %930 = vmatprep.subr.bf16.mxu1 %v2424_v23  ;;  %v2796_v23 = vld [vmem:[#allocation4 + $0x94] ss:$8 sps:$4 sm:$0xff]   ;;  %v2512_v25 = vcombine.high %v192_v20, %v196_v21  ;;  %v2511_v30 = vcombine.low %v192_v20, %v196_v21 }
  0x79   :  { %1848 = vmatpush1.bf16.msra.mxu0 %v2776_v53  ;;  %v162_v21 = vld [vmem:[#allocation2 + $0x2d8] sm:$0xff] }
  0x7a   :  { %1849 = vmatprep.subr.bf16.mxu0 %v2781_v56  ;;  %v118_v56 = vld [vmem:[#allocation2 + $0x178] sm:$0xff] }
  0x7b   :  { %931 = vmatpush1.bf16.msra.mxu1 %v2423_v26  ;;  %v74_v26 = vld [vmem:[#allocation2 + $0x18] sm:$0xff] }
  0x7c   :  { %932 = vmatprep.subr.bf16.mxu1 %v2432_v29  ;;  %v2799_v29 = vld [vmem:[#allocation4 + $0xa4] ss:$8 sps:$4 sm:$0xff]   ;;  %v2396_v31 = vcombine.high %v74_v26, %v78_v27 }
  0x7d   :  { %1850 = vmatpush1.bf16.msra.mxu0 %v2779_v60  ;;  %v126_v60 = vld [vmem:[#allocation2 + $0x1b8] sm:$0xff] }
  0x7e   :  { %1851 = vmatprep.subr.bf16.mxu0 %v2784_v62  ;;  %v2811_v62 = vld [vmem:[#allocation4 + $0xe4] ss:$8 sps:$4 sm:$0xff]  }
  0x7f   :  { %933 = vmatpush1.bf16.msra.mxu1 %v2431_v32  ;;  %v82_v32 = vld [vmem:[#allocation2 + $0x58] sm:$0xff] }
  0x80   :  { %934 = vmatprep.subr.bf16.mxu1 %v2440_v36  ;;  %v2395_v36 = vcombine.low %v74_v26, %v78_v27  ;;  %v2404_v37 = vcombine.high %v82_v32, %v86_v33  ;;  %v174_v26 = vld [vmem:[#allocation2 + $0x338] sm:$0xff] }
  0x81   :  { %1852 = vmatpush1.bf16.msra.mxu0 %v2782_v2  ;;  %v134_v2 = vld [vmem:[#allocation2 + $0x1f8] sm:$0xff] }
  0x82   :  { %1853 = vmatprep.subr.bf16.mxu0 %v2787_v4  ;;  %v2814_v4 = vld [vmem:[#allocation4 + $0xf4] ss:$8 sps:$4 sm:$0xff]  }
  0x83   :  { %935 = vmatpush1.bf16.msra.mxu1 %v2439_v38  ;;  %v90_v38 = vld [vmem:[#allocation2 + $0x98] sm:$0xff] }
  0x84   :  { %936 = vmatprep.subr.bf16.mxu1 %v2448_v42  ;;  %v2403_v42 = vcombine.low %v82_v32, %v86_v33  ;;  %v2412_v43 = vcombine.high %v90_v38, %v94_v39  ;;  %v186_v33 = vld [vmem:[#allocation2 + $0x398] sm:$0xff] }
  0x85   :  { %1854 = vmatpush1.bf16.msra.mxu0 %v2785_v8  ;;  %v142_v8 = vld [vmem:[#allocation2 + $0x238] sm:$0xff] }
  0x86   :  { %1855 = vmatprep.subr.bf16.mxu0 %v2790_v10  ;;  %v2817_v10 = vld [vmem:[#allocation4 + $0x104] ss:$8 sps:$4 sm:$0xff]   ;;  %v2459_v14 = vcombine.low %v138_v7, %v142_v8 }
  0x87   :  { %937 = vmatpush1.bf16.msra.mxu1 %v2447_v44  ;;  %v98_v44 = vld [vmem:[#allocation2 + $0xd8] sm:$0xff] }
  0x88   :  { %938 = vmatprep.subr.bf16.mxu1 %v2456_v48  ;;  %v2411_v48 = vcombine.low %v90_v38, %v94_v39  ;;  %v2420_v49 = vcombine.high %v98_v44, %v102_v45  ;;  %v2419_v53 = vcombine.low %v98_v44, %v102_v45  ;;  %v198_v38 = vld [vmem:[#allocation2 + $0x3f8] sm:$0xff]  ;;  %v3151_v45 = vld [vmem:[%s3285_s2] sm:$0xff] }
  0x89   :  { %1856 = vmatpush1.bf16.msra.mxu0 %v2788_v15 }
  0x8a   :  { %1857 = vmatprep.subr.bf16.mxu0 %v2793_v16  ;;  %v154_v16 = vld [vmem:[#allocation2 + $0x298] sm:$0xff] }
  0x8b   :  { %939 = vmatpush1.bf16.msra.mxu1 %v2455_v50  ;;  %v106_v50 = vld [vmem:[#allocation2 + $0x118] sm:$0xff] }
  0x8c   :  { %940 = vmatprep.subr.bf16.mxu1 %v2464_v54  ;;  %v114_v54 = vld [vmem:[#allocation2 + $0x158] sm:$0xff] }
  0x8d   :  { %1858 = vmatpush1.bf16.msra.mxu0 %v2791_v22  ;;  %v2436_v58 = vcombine.high %v114_v54, %v118_v56  ;;  %v166_v22 = vld [vmem:[#allocation2 + $0x2f8] sm:$0xff] }
  0x8e   :  { %1859 = vmatprep.subr.bf16.mxu0 %v2796_v23  ;;  %v2483_v27 = vcombine.low %v162_v21, %v166_v22 }
  0x8f   :  { %941 = vmatpush1.bf16.msra.mxu1 %v2463_v57  ;;  %v2427_v57 = vcombine.low %v106_v50, %v110_v51 }
  0x90   :  { %942 = vmatprep.subr.bf16.mxu1 %v2472_v61  ;;  %v2435_v61 = vcombine.low %v114_v54, %v118_v56 }
  0x91   :  { %1860 = vmatpush1.bf16.msra.mxu0 %v2794_v28 }
  0x92   :  { %1861 = vmatprep.subr.bf16.mxu0 %v2799_v29  ;;  %v178_v29 = vld [vmem:[#allocation2 + $0x358] sm:$0xff] }
  0x93   :  { %943 = vmatpush1.bf16.msra.mxu1 %v2471_v63  ;;  %v2444_v63 = vcombine.high %v122_v59, %v126_v60 }
  0x94   :  { %944 = vmatprep.subr.bf16.mxu1 %v2480_v3  ;;  %v2443_v3 = vcombine.low %v122_v59, %v126_v60  ;;  %v2820_v59 = vld [vmem:[#allocation4 + $0x114] ss:$8 sps:$4 sm:$0xff]   ;;  %v2818_v60 = vld [vmem:[#allocation4 + $0x110] ss:$8 sps:$4 sm:$0xff]  }
  0x95   :  { %1862 = vmatpush1.bf16.msra.mxu0 %v2797_v34  ;;  %v190_v34 = vld [vmem:[#allocation2 + $0x3b8] sm:$0xff] }
  0x96   :  { %1863 = vmatprep.subr.bf16.mxu0 %v2802_v35  ;;  %v2507_v39 = vcombine.low %v186_v33, %v190_v34 }
  0x97   :  { %945 = vmatpush1.bf16.msra.mxu1 %v2479_v5  ;;  %v2452_v5 = vcombine.high %v130_v1, %v134_v2 }
  0x98   :  { %946 = vmatprep.subr.bf16.mxu1 %v2488_v9  ;;  %v2451_v9 = vcombine.low %v130_v1, %v134_v2  ;;  %v2829_v1 = vld [vmem:[#allocation4 + $0x144] ss:$8 sps:$4 sm:$0xff]   ;;  %v2827_v2 = vld [vmem:[#allocation4 + $0x140] ss:$8 sps:$4 sm:$0xff]  }
  0x99   :  { %1864 = vmatpush1.bf16.msra.mxu0 %v2800_v40 }
  0x9a   :  { %1865 = vmatprep.subr.bf16.mxu0 %v2805_v41 }
  0x9b   :  { %947 = vmatpush1.bf16.msra.mxu1 %v2487_v11  ;;  %v2460_v11 = vcombine.high %v138_v7, %v142_v8  ;;  %v2830_v8 = vld [vmem:[#allocation4 + $0x150] ss:$8 sps:$4 sm:$0xff]  }
  0x9c   :  { %948 = vmatprep.subr.bf16.mxu1 %v2496_v13  ;;  %v150_v13 = vld [vmem:[#allocation2 + $0x278] sm:$0xff] }
  0x9d   :  { %1866 = vmatpush1.bf16.msra.mxu0 %v2803_v46  ;;  %v2468_v15 = vcombine.high %v146_v12, %v150_v13 }
  0x9e   :  { %1867 = vmatprep.subr.bf16.mxu0 %v2808_v47 }
  0x9f   :  { %949 = vmatpush1.bf16.msra.mxu1 %v2495_v17  ;;  %v158_v17 = vld [vmem:[#allocation2 + $0x2b8] sm:$0xff] }
  0xa0   :  { %950 = vmatprep.subr.bf16.mxu1 %v2504_v19  ;;  %v2467_v19 = vcombine.low %v146_v12, %v150_v13  ;;  %v2476_v20 = vcombine.high %v154_v16, %v158_v17  ;;  %v2475_v23 = vcombine.low %v154_v16, %v158_v17  ;;  %v2836_v12 = vld [vmem:[#allocation4 + $0x170] ss:$8 sps:$4 sm:$0xff]   ;;  %v2841_v13 = vld [vmem:[#allocation4 + $0x184] ss:$8 sps:$4 sm:$0xff]  }
  0xa1   :  { %1868 = vmatpush1.bf16.msra.mxu0 %v2806_v52  ;;  %v2842_v16 = vld [vmem:[#allocation4 + $0x190] ss:$8 sps:$4 sm:$0xff]   ;;  %v2847_v17 = vld [vmem:[#allocation4 + $0x1a4] ss:$8 sps:$4 sm:$0xff]  }
  0xa2   :  { %1869 = vmatprep.subr.bf16.mxu0 %v2811_v62  ;;  %v2821_v62 = vld [vmem:[#allocation4 + $0x120] ss:$8 sps:$4 sm:$0xff]  }
  0xa3   :  { %951 = vmatpush1.bf16.msra.mxu1 %v2503_v24  ;;  %v2484_v24 = vcombine.high %v162_v21, %v166_v22  ;;  %v2848_v21 = vld [vmem:[#allocation4 + $0x1b0] ss:$8 sps:$4 sm:$0xff]   ;;  %v2853_v22 = vld [vmem:[#allocation4 + $0x1c4] ss:$8 sps:$4 sm:$0xff]  }
  0xa4   :  { %952 = vmatprep.subr.bf16.mxu1 %v2512_v25  ;;  %v170_v25 = vld [vmem:[#allocation2 + $0x318] sm:$0xff] }
  0xa5   :  { %1870 = vmatpush1.bf16.msra.mxu0 %v2809_v0  ;;  %v2492_v28 = vcombine.high %v170_v25, %v174_v26  ;;  %v2824_v0 = vld [vmem:[#allocation4 + $0x130] ss:$8 sps:$4 sm:$0xff]  }
  0xa6   :  { %1871 = vmatprep.subr.bf16.mxu0 %v2814_v4  ;;  %v2832_v4 = vld [vmem:[#allocation4 + $0x154] ss:$8 sps:$4 sm:$0xff]  }
  0xa7   :  { %953 = vmatpush1.bf16.msra.mxu1 %v2511_v30  ;;  %v182_v30 = vld [vmem:[#allocation2 + $0x378] sm:$0xff] }
  0xa8   :  { %1004 = vmatprep.subr.bf16.mxu1 %v2396_v31  ;;  %v2491_v31 = vcombine.low %v170_v25, %v174_v26  ;;  %v2500_v32 = vcombine.high %v178_v29, %v182_v30  ;;  %v2499_v35 = vcombine.low %v178_v29, %v182_v30  ;;  %v2856_v25 = vld [vmem:[#allocation4 + $0x1d4] ss:$8 sps:$4 sm:$0xff]   ;;  %v2859_v30 = vld [vmem:[#allocation4 + $0x1e4] ss:$8 sps:$4 sm:$0xff]  }
  0xa9   :  { %1872 = vmatpush1.bf16.msra.mxu0 %v2812_v6 }
  0xaa   :  { %955 = vmatmul.mubr.bf16.vlgmr.msra.gmra.mrb[4].mxu1 %v3137_v55  ;;  %1882 = vmatprep.subr.bf16.mxu0 %v2817_v10  ;;  %v2833_v10 = vld [vmem:[#allocation4 + $0x160] ss:$8 sps:$4 sm:$0xff]  }
  0xab   :  { %1005 = vmatpush1.bf16.msra.mxu1 %v2395_v36  ;;  %1036 = vmatprep.mubr.bf16.mxu1 %v3130_v18  ;;  %v2428_v18 = vcombine.high %v106_v50, %v110_v51  ;;  %v2508_v36 = vcombine.high %v186_v33, %v190_v34 }
  0xac   :  { %1006 = vmatprep.subr.bf16.mxu1 %v2404_v37  ;;  %v194_v37 = vld [vmem:[#allocation2 + $0x3d8] sm:$0xff] }
  0xad   :  { %v2516_v40 = vcombine.high %v194_v37, %v198_v38  ;;  %v2515_v41 = vcombine.low %v194_v37, %v198_v38 }
  0xaf   :  { %1007 = vmatpush1.bf16.msra.mxu1 %v2403_v42  ;;  %v201_v42 = vlaneseq }
  0xb0   :  { %1008 = vmatprep.subr.bf16.mxu1 %v2412_v43 }
  0xb1   :  { %v3145_v43 = vshrl.u32 %v201_v42, 7 }
  0xb3   :  { %1009 = vmatpush1.bf16.msra.mxu1 %v2411_v48  ;;  %v203_v44 = vsub.s32 0, %v3145_v43  ;;  %v207_v46 = vsub.s32 1, %v3145_v43  ;;  %v211_v26 = vsub.s32 2, %v3145_v43 }
  0xb4   :  { %1010 = vmatprep.subr.bf16.mxu1 %v2420_v49 }
  0xb5   :  { %v204_v47 = vrot.slane %v3151_v45, %v203_v44 }
  0xb7   :  { %1011 = vmatpush1.bf16.msra.mxu1 %v2419_v53 }
  0xb8   :  { %1012 = vmatprep.subr.bf16.mxu1 %v2428_v18 }
  0xbb   :  { %1013 = vmatpush1.bf16.msra.mxu1 %v2427_v57  ;;  %v2815_v57 = vld [vmem:[#allocation4 + $0x100] ss:$8 sps:$4 sm:$0xff]  }
  0xbc   :  { %1014 = vmatprep.subr.bf16.mxu1 %v2436_v58 }
  0xbf   :  { %1015 = vmatpush1.bf16.msra.mxu1 %v2435_v61  ;;  %v2823_v61 = vld [vmem:[#allocation4 + $0x124] ss:$8 sps:$4 sm:$0xff]  }
  0xc0   :  { %1016 = vmatprep.subr.bf16.mxu1 %v2444_v63  ;;  %v2826_v63 = vld [vmem:[#allocation4 + $0x134] ss:$8 sps:$4 sm:$0xff]  }
  0xc3   :  { %1017 = vmatpush1.bf16.msra.mxu1 %v2443_v3 }
  0xc4   :  { %1018 = vmatprep.subr.bf16.mxu1 %v2452_v5 }
  0xc7   :  { %1019 = vmatpush1.bf16.msra.mxu1 %v2451_v9  ;;  %v2835_v9 = vld [vmem:[#allocation4 + $0x164] ss:$8 sps:$4 sm:$0xff]  }
  0xc8   :  { %1020 = vmatprep.subr.bf16.mxu1 %v2460_v11  ;;  %v2838_v11 = vld [vmem:[#allocation4 + $0x174] ss:$8 sps:$4 sm:$0xff]  }
  0xcb   :  { %1021 = vmatpush1.bf16.msra.mxu1 %v2459_v14  ;;  %v2839_v14 = vld [vmem:[#allocation4 + $0x180] ss:$8 sps:$4 sm:$0xff]  }
  0xcc   :  { %1022 = vmatprep.subr.bf16.mxu1 %v2468_v15  ;;  %v2844_v15 = vld [vmem:[#allocation4 + $0x194] ss:$8 sps:$4 sm:$0xff]  }
  0xcf   :  { %1023 = vmatpush1.bf16.msra.mxu1 %v2467_v19  ;;  %v2845_v19 = vld [vmem:[#allocation4 + $0x1a0] ss:$8 sps:$4 sm:$0xff]  }
  0xd0   :  { %1024 = vmatprep.subr.bf16.mxu1 %v2476_v20  ;;  %v2850_v20 = vld [vmem:[#allocation4 + $0x1b4] ss:$8 sps:$4 sm:$0xff]  }
  0xd3   :  { %1025 = vmatpush1.bf16.msra.mxu1 %v2475_v23  ;;  %v2851_v23 = vld [vmem:[#allocation4 + $0x1c0] ss:$8 sps:$4 sm:$0xff]  }
  0xd4   :  { %1026 = vmatprep.subr.bf16.mxu1 %v2484_v24  ;;  %v223_v24 = vsub.s32 5, %v3145_v43 }
  0xd6   :  { %v224_v29 = vrot.slane %v3151_v45, %v223_v24  ;;  %v2898_v24 = vld [vmem:[#allocation4 + $0x2b4] ss:$8 sps:$4 sm:$0xff]  }
  0xd7   :  { %1027 = vmatpush1.bf16.msra.mxu1 %v2483_v27  ;;  %v2854_v27 = vld [vmem:[#allocation4 + $0x1d0] ss:$8 sps:$4 sm:$0xff]  }
  0xd8   :  { %1028 = vmatprep.subr.bf16.mxu1 %v2492_v28  ;;  %v215_v28 = vsub.s32 3, %v3145_v43 }
  0xda   :  { %v216_v33 = vrot.slane %v3151_v45, %v215_v28  ;;  %v2899_v28 = vld [vmem:[#allocation4 + $0x2c0] ss:$8 sps:$4 sm:$0xff]  }
  0xdb   :  { %1029 = vmatpush1.bf16.msra.mxu1 %v2491_v31  ;;  %v212_v31 = vrot.slane %v3151_v45, %v211_v26  ;;  %v2901_v26 = vld [vmem:[#allocation4 + $0x2c4] ss:$8 sps:$4 sm:$0xff]  }
  0xdc   :  { %1030 = vmatprep.subr.bf16.mxu1 %v2500_v32  ;;  %v2857_v32 = vld [vmem:[#allocation4 + $0x1e0] ss:$8 sps:$4 sm:$0xff]  }
  0xdf   :  { %1031 = vmatpush1.bf16.msra.mxu1 %v2499_v35  ;;  %v2862_v35 = vld [vmem:[#allocation4 + $0x1f4] ss:$8 sps:$4 sm:$0xff]  }
  0xe0   :  { %1032 = vmatprep.subr.bf16.mxu1 %v2508_v36 }
  0xe3   :  { %1033 = vmatpush1.bf16.msra.mxu1 %v2507_v39 }
  0xe4   :  { %1034 = vmatprep.subr.bf16.mxu1 %v2516_v40 }
  0xe7   :  { %1035 = vmatpush1.bf16.msra.mxu1 %v2515_v41  ;;  %v2860_v41 = vld [vmem:[#allocation4 + $0x1f0] ss:$8 sps:$4 sm:$0xff]  }
  0xea   :  { %1037 = vmatmul.mubr.bf16.vlgmr.msra.gmra.mrb[8].mxu1 %v3137_v55  ;;  %v208_v55 = vrot.slane %v3151_v45, %v207_v46 }
 0x13d   :  { %v915_v48 = vpop.f32.mrb[0].mxu1 }
 0x13e   :  { %v916_v49 = vadd.f32 %v915_v48, %v204_v47  ;;  %v917_v50 = vpop.f32.mrb[1].mxu1  ;;  %v2865_v48 = vld [vmem:[#allocation4 + $0x204] ss:$8 sps:$4 sm:$0xff]  }
 0x13f   :  { %v918_v51 = vadd.f32 %v917_v50, %v208_v55  ;;  %v919_v52 = vpop.f32.mrb[2].mxu1  ;;  %v3160_v3 = vpop.f32.mrb[0].mxu0 }
 0x140   :  { %v1045_v53 = vmax.f32 %v916_v49, 0.0  ;;  %v920_v18 = vpop.f32.mrb[3].mxu1  ;;  %v999_v5 = vpop.f32.mrb[1].mxu0 }
 0x141   :  { %v1046_v54 = vmax.f32 %v918_v51, 0.0  ;;  %v1001_v6 = vpop.f32.mrb[2].mxu0  ;;  %v1000_v34 = vadd.f32 %v999_v5, %v224_v29  ;;  %v2863_v51 = vld [vmem:[#allocation4 + $0x200] ss:$8 sps:$4 sm:$0xff]   ;;  %v2868_v18 = vld [vmem:[#allocation4 + $0x214] ss:$8 sps:$4 sm:$0xff]  }
 0x142   :  { %v1053_v58 = vpack.c.bf16 %v1045_v53, %v1045_v53  ;;  %v1002_v7 = vpop.f32.mrb[3].mxu0  ;;  %v2966_v5 = vld [vmem:[%s3288_s5 + $0x18] sm:$0xff]   ;;  %v2967_v6 = vld [vmem:[%s3288_s5 + $0x60] sm:$0xff]  }
 0x143   :  { %v1054_v56 = vpack.c.bf16 %v1046_v54, %v1046_v54  ;;  %v1050_v42 = vmax.f32 %v1000_v34, 0.0  ;;  %v2959_v54 = vld [vmem:[%s3288_s5 + $0x40] sm:$0xff]   ;;  %v2904_v29 = vld [vmem:[#allocation4 + $0x2d4] ss:$8 sps:$4 sm:$0xff]  }
 0x144   :  { %2677 = vmatprep.subr.bf16.mxu1 %v2959_v54  ;;  %v2875_v7 = vld [vmem:[#allocation4 + $0x240] ss:$8 sps:$4 sm:$0xff]  }
 0x145   :  { %1873 = vmatprep.mubr.bf16.mxu0 %v1054_v56  ;;  %v1058_v52 = vpack.c.bf16 %v1050_v42, %v1050_v42  ;;  %v2960_v56 = vld [vmem:[%s3288_s5] sm:$0xff]  }
 0x146   :  { %1874 = vmatmul.mubr.bf16.vlgmr.msra.gmra.mrb[4].mxu0 %v1053_v58  ;;  %v2866_v58 = vld [vmem:[#allocation4 + $0x210] ss:$8 sps:$4 sm:$0xff]   ;;  %2678 = vmatpush3.bf16.msra.mxu1 %v2960_v56  ;;  %v2917_v54 = vld [vmem:[#allocation4 + $0x320] ss:$8 sps:$4 sm:$0xff]   ;;  %v2922_v56 = vld [vmem:[#allocation4 + $0x334] ss:$8 sps:$4 sm:$0xff]  }
 0x147   :  { %1883 = vmatpush1.bf16.msra.mxu0 %v2815_v57  ;;  %v2961_v57 = vld [vmem:[%s3288_s5 + $0x48] sm:$0xff]  }
 0x148   :  { %1884 = vmatprep.subr.bf16.mxu0 %v2820_v59  ;;  %v2871_v59 = vld [vmem:[#allocation4 + $0x224] ss:$8 sps:$4 sm:$0xff]   ;;  %2679 = vmatprep.subr.bf16.mxu1 %v2961_v57  ;;  %v2920_v57 = vld [vmem:[#allocation4 + $0x330] ss:$8 sps:$4 sm:$0xff]  }
 0x14b   :  { %1885 = vmatpush1.bf16.msra.mxu0 %v2818_v60  ;;  %v2962_v60 = vld [vmem:[%s3288_s5 + $0x8] sm:$0xff]  }
 0x14c   :  { %1886 = vmatprep.subr.bf16.mxu0 %v2823_v61  ;;  %v2963_v61 = vld [vmem:[%s3288_s5 + $0x50] sm:$0xff]   ;;  %2680 = vmatpush3.bf16.msra.mxu1 %v2962_v60 }
 0x14d   :  { %2681 = vmatprep.subr.bf16.mxu1 %v2963_v61  ;;  %v2928_v60 = vld [vmem:[#allocation4 + $0x354] ss:$8 sps:$4 sm:$0xff]   ;;  %v2926_v61 = vld [vmem:[#allocation4 + $0x350] ss:$8 sps:$4 sm:$0xff]  }
 0x14f   :  { %1887 = vmatpush1.bf16.msra.mxu0 %v2821_v62  ;;  %v2869_v62 = vld [vmem:[#allocation4 + $0x220] ss:$8 sps:$4 sm:$0xff]  }
 0x150   :  { %1888 = vmatprep.subr.bf16.mxu0 %v2826_v63  ;;  %v2874_v63 = vld [vmem:[#allocation4 + $0x234] ss:$8 sps:$4 sm:$0xff]  }
 0x153   :  { %1889 = vmatpush1.bf16.msra.mxu0 %v2824_v0  ;;  %v2964_v0 = vld [vmem:[%s3288_s5 + $0x10] sm:$0xff]  }
 0x154   :  { %1890 = vmatprep.subr.bf16.mxu0 %v2829_v1  ;;  %v2965_v1 = vld [vmem:[%s3288_s5 + $0x58] sm:$0xff]   ;;  %2682 = vmatpush3.bf16.msra.mxu1 %v2964_v0 }
 0x155   :  { %2683 = vmatprep.subr.bf16.mxu1 %v2965_v1  ;;  %v2934_v0 = vld [vmem:[#allocation4 + $0x374] ss:$8 sps:$4 sm:$0xff]   ;;  %v2932_v1 = vld [vmem:[#allocation4 + $0x370] ss:$8 sps:$4 sm:$0xff]  }
 0x157   :  { %1891 = vmatpush1.bf16.msra.mxu0 %v2827_v2  ;;  %v2872_v2 = vld [vmem:[#allocation4 + $0x230] ss:$8 sps:$4 sm:$0xff]  }
 0x158   :  { %1892 = vmatprep.subr.bf16.mxu0 %v2832_v4  ;;  %v2877_v4 = vld [vmem:[#allocation4 + $0x244] ss:$8 sps:$4 sm:$0xff]   ;;  %2684 = vmatpush3.bf16.msra.mxu1 %v2966_v5  ;;  %v2940_v5 = vld [vmem:[#allocation4 + $0x394] ss:$8 sps:$4 sm:$0xff]  }
 0x159   :  { %2685 = vmatprep.subr.bf16.mxu1 %v2967_v6  ;;  %v2938_v6 = vld [vmem:[#allocation4 + $0x390] ss:$8 sps:$4 sm:$0xff]  }
 0x15b   :  { %1893 = vmatpush1.bf16.msra.mxu0 %v2830_v8  ;;  %v2880_v8 = vld [vmem:[#allocation4 + $0x254] ss:$8 sps:$4 sm:$0xff]  }
 0x15c   :  { %1894 = vmatprep.subr.bf16.mxu0 %v2835_v9  ;;  %v2968_v9 = vld [vmem:[%s3288_s5 + $0x20] sm:$0xff]  }
 0x15d   :  { %2686 = vmatpush3.bf16.msra.mxu1 %v2968_v9  ;;  %v2946_v9 = vld [vmem:[#allocation4 + $0x3b4] ss:$8 sps:$4 sm:$0xff]  }
 0x15f   :  { %1895 = vmatpush1.bf16.msra.mxu0 %v2833_v10  ;;  %v2969_v10 = vld [vmem:[%s3288_s5 + $0x68] sm:$0xff]  }
 0x160   :  { %1896 = vmatprep.subr.bf16.mxu0 %v2838_v11  ;;  %v2878_v11 = vld [vmem:[#allocation4 + $0x250] ss:$8 sps:$4 sm:$0xff]   ;;  %2687 = vmatprep.subr.bf16.mxu1 %v2969_v10 }
 0x161   :  { %v2944_v10 = vld [vmem:[#allocation4 + $0x3b0] ss:$8 sps:$4 sm:$0xff]  }
 0x163   :  { %1897 = vmatpush1.bf16.msra.mxu0 %v2836_v12  ;;  %v2883_v12 = vld [vmem:[#allocation4 + $0x264] ss:$8 sps:$4 sm:$0xff]  }
 0x164   :  { %1898 = vmatprep.subr.bf16.mxu0 %v2841_v13  ;;  %v2970_v13 = vld [vmem:[%s3288_s5 + $0x28] sm:$0xff]  }
 0x165   :  { %2688 = vmatpush3.bf16.msra.mxu1 %v2970_v13  ;;  %v227_v13 = vsub.s32 6, %v3145_v43 }
 0x167   :  { %1899 = vmatpush1.bf16.msra.mxu0 %v2839_v14  ;;  %v2881_v14 = vld [vmem:[#allocation4 + $0x260] ss:$8 sps:$4 sm:$0xff]  }
 0x168   :  { %1900 = vmatprep.subr.bf16.mxu0 %v2844_v15  ;;  %v2886_v15 = vld [vmem:[#allocation4 + $0x274] ss:$8 sps:$4 sm:$0xff]  }
 0x16b   :  { %1901 = vmatpush1.bf16.msra.mxu0 %v2842_v16  ;;  %v2884_v16 = vld [vmem:[#allocation4 + $0x270] ss:$8 sps:$4 sm:$0xff]  }
 0x16c   :  { %1902 = vmatprep.subr.bf16.mxu0 %v2847_v17  ;;  %v2889_v17 = vld [vmem:[#allocation4 + $0x284] ss:$8 sps:$4 sm:$0xff]  }
 0x16f   :  { %1903 = vmatpush1.bf16.msra.mxu0 %v2845_v19  ;;  %v2887_v19 = vld [vmem:[#allocation4 + $0x280] ss:$8 sps:$4 sm:$0xff]  }
 0x170   :  { %1904 = vmatprep.subr.bf16.mxu0 %v2850_v20  ;;  %v2892_v20 = vld [vmem:[#allocation4 + $0x294] ss:$8 sps:$4 sm:$0xff]  }
 0x173   :  { %1905 = vmatpush1.bf16.msra.mxu0 %v2848_v21  ;;  %v2890_v21 = vld [vmem:[#allocation4 + $0x290] ss:$8 sps:$4 sm:$0xff]  }
 0x174   :  { %1906 = vmatprep.subr.bf16.mxu0 %v2853_v22  ;;  %v2895_v22 = vld [vmem:[#allocation4 + $0x2a4] ss:$8 sps:$4 sm:$0xff]  }
 0x177   :  { %1907 = vmatpush1.bf16.msra.mxu0 %v2851_v23  ;;  %v2893_v23 = vld [vmem:[#allocation4 + $0x2a0] ss:$8 sps:$4 sm:$0xff]  }
 0x178   :  { %1908 = vmatprep.subr.bf16.mxu0 %v2856_v25  ;;  %v2896_v25 = vld [vmem:[#allocation4 + $0x2b0] ss:$8 sps:$4 sm:$0xff]  }
 0x17b   :  { %1909 = vmatpush1.bf16.msra.mxu0 %v2854_v27  ;;  %v219_v27 = vsub.s32 4, %v3145_v43 }
 0x17c   :  { %1910 = vmatprep.subr.bf16.mxu0 %v2859_v30 }
 0x17d   :  { %v956_v36 = vpop.f32.mrb[4].mxu1  ;;  %v220_v30 = vrot.slane %v3151_v45, %v219_v27  ;;  %v2974_v27 = vld [vmem:[%s3288_s5 + $0x38] sm:$0xff]  }
 0x17e   :  { %v957_v37 = vadd.f32 %v956_v36, %v212_v31  ;;  %v958_v38 = vpop.f32.mrb[5].mxu1  ;;  %v2902_v31 = vld [vmem:[#allocation4 + $0x2d0] ss:$8 sps:$4 sm:$0xff]  }
 0x17f   :  { %v959_v39 = vadd.f32 %v958_v38, %v216_v33  ;;  %1911 = vmatpush1.bf16.msra.mxu0 %v2857_v32  ;;  %v960_v40 = vpop.f32.mrb[6].mxu1  ;;  %v231_v32 = vsub.s32 7, %v3145_v43  ;;  %v2907_v33 = vld [vmem:[#allocation4 + $0x2e4] ss:$8 sps:$4 sm:$0xff]   ;;  %v998_v34 = vadd.f32 %v3160_v3, %v220_v30  ;;  %v2911_v3 = vld [vmem:[#allocation4 + $0x300] ss:$8 sps:$4 sm:$0xff]  }
 0x180   :  { %v1047_v47 = vmax.f32 %v957_v37, 0.0  ;;  %v961_v55 = vpop.f32.mrb[7].mxu1  ;;  %1912 = vmatprep.subr.bf16.mxu0 %v2862_v35  ;;  %v2905_v35 = vld [vmem:[#allocation4 + $0x2e0] ss:$8 sps:$4 sm:$0xff]   ;;  %v2910_v37 = vld [vmem:[#allocation4 + $0x2f4] ss:$8 sps:$4 sm:$0xff]  }
 0x181   :  { %v1048_v49 = vmax.f32 %v959_v39, 0.0  ;;  %v232_v36 = vrot.slane %v3151_v45, %v231_v32  ;;  %v1049_v39 = vmax.f32 %v998_v34, 0.0  ;;  %v2913_v55 = vld [vmem:[#allocation4 + $0x304] ss:$8 sps:$4 sm:$0xff]  }
 0x182   :  { %v1055_v53 = vpack.c.bf16 %v1047_v47, %v1047_v47  ;;  %v2976_v43 = vld [vmem:[%s3290_s7 + $0x8] sm:$0xff]  }
 0x183   :  { %v1056_v50 = vpack.c.bf16 %v1048_v49, %v1048_v49  ;;  %1913 = vmatpush1.bf16.msra.mxu0 %v2860_v41  ;;  %v2908_v41 = vld [vmem:[#allocation4 + $0x2f0] ss:$8 sps:$4 sm:$0xff]  }
 0x184   :  { %1923 = vmatprep.subr.bf16.mxu0 %v2865_v48 }
 0x185   :  { %1914 = vmatprep.mubr.bf16.mxu0 %v1056_v50  ;;  %v1057_v50 = vpack.c.bf16 %v1049_v39, %v1049_v39 }
 0x186   :  { %1915 = vmatmul.mubr.bf16.vlgmr.msra.gmra.mrb[4].mxu0 %v1055_v53  ;;  %v2914_v53 = vld [vmem:[#allocation4 + $0x310] ss:$8 sps:$4 sm:$0xff]  }
 0x187   :  { %1924 = vmatpush1.bf16.msra.mxu0 %v2863_v51  ;;  %1955 = vmatprep.mubr.bf16.mxu0 %v1058_v52  ;;  %v2916_v52 = vld [vmem:[#allocation4 + $0x314] ss:$8 sps:$4 sm:$0xff]  }
 0x188   :  { %1925 = vmatprep.subr.bf16.mxu0 %v2868_v18  ;;  %v2919_v18 = vld [vmem:[#allocation4 + $0x324] ss:$8 sps:$4 sm:$0xff]  }
 0x18b   :  { %1926 = vmatpush1.bf16.msra.mxu0 %v2866_v58  ;;  %v2925_v58 = vld [vmem:[#allocation4 + $0x344] ss:$8 sps:$4 sm:$0xff]  }
 0x18c   :  { %1927 = vmatprep.subr.bf16.mxu0 %v2871_v59  ;;  %v2923_v59 = vld [vmem:[#allocation4 + $0x340] ss:$8 sps:$4 sm:$0xff]  }
 0x18f   :  { %1928 = vmatpush1.bf16.msra.mxu0 %v2869_v62  ;;  %v2931_v62 = vld [vmem:[#allocation4 + $0x364] ss:$8 sps:$4 sm:$0xff]  }
 0x190   :  { %1929 = vmatprep.subr.bf16.mxu0 %v2874_v63  ;;  %v2929_v63 = vld [vmem:[#allocation4 + $0x360] ss:$8 sps:$4 sm:$0xff]  }
 0x193   :  { %1930 = vmatpush1.bf16.msra.mxu0 %v2872_v2  ;;  %v2937_v2 = vld [vmem:[#allocation4 + $0x384] ss:$8 sps:$4 sm:$0xff]  }
 0x194   :  { %1931 = vmatprep.subr.bf16.mxu0 %v2877_v4  ;;  %v2935_v4 = vld [vmem:[#allocation4 + $0x380] ss:$8 sps:$4 sm:$0xff]  }
 0x197   :  { %1932 = vmatpush1.bf16.msra.mxu0 %v2875_v7  ;;  %v2943_v7 = vld [vmem:[#allocation4 + $0x3a4] ss:$8 sps:$4 sm:$0xff]  }
 0x198   :  { %1933 = vmatprep.subr.bf16.mxu0 %v2880_v8  ;;  %v2941_v8 = vld [vmem:[#allocation4 + $0x3a0] ss:$8 sps:$4 sm:$0xff]  }
 0x19b   :  { %1934 = vmatpush1.bf16.msra.mxu0 %v2878_v11  ;;  %v2949_v11 = vld [vmem:[#allocation4 + $0x3c4] ss:$8 sps:$4 sm:$0xff]  }
 0x19c   :  { %1935 = vmatprep.subr.bf16.mxu0 %v2883_v12  ;;  %v2947_v12 = vld [vmem:[#allocation4 + $0x3c0] ss:$8 sps:$4 sm:$0xff]  }
 0x19f   :  { %1936 = vmatpush1.bf16.msra.mxu0 %v2881_v14  ;;  %v2952_v14 = vld [vmem:[#allocation4 + $0x3d4] ss:$8 sps:$4 sm:$0xff]  }
 0x1a0   :  { %1937 = vmatprep.subr.bf16.mxu0 %v2886_v15  ;;  %v2950_v15 = vld [vmem:[#allocation4 + $0x3d0] ss:$8 sps:$4 sm:$0xff]  }
 0x1a3   :  { %1938 = vmatpush1.bf16.msra.mxu0 %v2884_v16  ;;  %v228_v16 = vrot.slane %v3151_v45, %v227_v13  ;;  %v2972_v45 = vld [vmem:[%s3288_s5 + $0x30] sm:$0xff]  }
 0x1a4   :  { %1939 = vmatprep.subr.bf16.mxu0 %v2889_v17  ;;  %v2955_v17 = vld [vmem:[#allocation4 + $0x3e4] ss:$8 sps:$4 sm:$0xff]  }
 0x1a7   :  { %1940 = vmatpush1.bf16.msra.mxu0 %v2887_v19  ;;  %v2953_v19 = vld [vmem:[#allocation4 + $0x3e0] ss:$8 sps:$4 sm:$0xff]  }
 0x1a8   :  { %1941 = vmatprep.subr.bf16.mxu0 %v2892_v20 }
 0x1ab   :  { %1942 = vmatpush1.bf16.msra.mxu0 %v2890_v21  ;;  %v2958_v21 = vld [vmem:[#allocation4 + $0x3f4] ss:$8 sps:$4 sm:$0xff]  }
 0x1ac   :  { %1943 = vmatprep.subr.bf16.mxu0 %v2895_v22  ;;  %v2956_v22 = vld [vmem:[#allocation4 + $0x3f0] ss:$8 sps:$4 sm:$0xff]  }
 0x1af   :  { %1944 = vmatpush1.bf16.msra.mxu0 %v2893_v23 }
 0x1b0   :  { %1945 = vmatprep.subr.bf16.mxu0 %v2898_v24 }
 0x1b3   :  { %1946 = vmatpush1.bf16.msra.mxu0 %v2896_v25  ;;  %v2971_v25 = vld [vmem:[%s3288_s5 + $0x70] sm:$0xff]  }
 0x1b4   :  { %1947 = vmatprep.subr.bf16.mxu0 %v2901_v26  ;;  %2689 = vmatprep.subr.bf16.mxu1 %v2971_v25  ;;  %v2973_v26 = vld [vmem:[%s3288_s5 + $0x78] sm:$0xff]  }
 0x1b5   :  { %2690 = vmatpush3.bf16.msra.mxu1 %v2972_v45 }
 0x1b6   :  { %2691 = vmatprep.subr.bf16.mxu1 %v2973_v26 }
 0x1b7   :  { %1948 = vmatpush1.bf16.msra.mxu0 %v2899_v28  ;;  %v3041_v28 = vmov 0.0  }
 0x1b8   :  { %1949 = vmatprep.subr.bf16.mxu0 %v2904_v29  ;;  %v1189_v29 = vld [vmem:[%s3287_s4] sm:$0x3] }
 0x1b9   :  { %2692 = vmatpush3.bf16.msra.mxu1 %v2974_v27  ;;  %v1194_v30 = vrot.slane %v1189_v29, %v203_v44  ;;  %v2977_v44 = vld [vmem:[%s3290_s7 + $0x10] sm:$0xff]  }
 0x1ba   :  { %2713 = vmatprep.subr.bf16.mxu1 %v3041_v28 }
 0x1bb   :  { %1950 = vmatpush1.bf16.msra.mxu0 %v2902_v31  ;;  %v1198_v31 = vrot.slane %v1189_v29, %v207_v46  ;;  %v2978_v46 = vld [vmem:[%s3290_s7 + $0x18] sm:$0xff]  }
 0x1bc   :  { %1951 = vmatprep.subr.bf16.mxu0 %v2907_v33 }
 0x1bd   :  { %v3209_v38 = vpop.f32.mrb[8].mxu1 }
 0x1be   :  { %v1040_v40 = vpop.f32.mrb[9].mxu1  ;;  %v1039_v20 = vadd.f32 %v3209_v38, %v228_v16 }
 0x1bf   :  { %1952 = vmatpush1.bf16.msra.mxu0 %v2905_v35  ;;  %v1041_v42 = vadd.f32 %v1040_v40, %v232_v36  ;;  %v1042_v47 = vpop.f32.mrb[10].mxu1 }
 0x1c0   :  { %1953 = vmatprep.subr.bf16.mxu0 %v2910_v37  ;;  %v1043_v48 = vpop.f32.mrb[11].mxu1  ;;  %v1051_v23 = vmax.f32 %v1039_v20, 0.0 }
 0x1c1   :  { %v1052_v49 = vmax.f32 %v1041_v42, 0.0 }
 0x1c2   :  { %v1059_v24 = vpack.c.bf16 %v1051_v23, %v1051_v23 }
 0x1c3   :  { %1954 = vmatpush1.bf16.msra.mxu0 %v2908_v41  ;;  %v1060_v51 = vpack.c.bf16 %v1052_v49, %v1052_v49  ;;  %v2975_v41 = vld [vmem:[%s3290_s7] sm:$0xff]  }
 0x1c4   :  { %1964 = vmatprep.subr.bf16.mxu0 %v2913_v55  ;;  %v2645_v55 = vld [vmem:[%s3289_s6] ss:$0 sm:$0xff] }
 0x1c6   :  { %1956 = vmatmul.mubr.bf16.vlgmr.msra.gmra.mrb[4].mxu0 %v1057_v50 }
 0x1c7   :  { %1965 = vmatpush1.bf16.msra.mxu0 %v2911_v3  ;;  %1996 = vmatprep.mubr.bf16.mxu0 %v1060_v51 }
 0x1c8   :  { %1966 = vmatprep.subr.bf16.mxu0 %v2916_v52 }
 0x1cb   :  { %1967 = vmatpush1.bf16.msra.mxu0 %v2914_v53  ;;  %v2979_v53 = vld [vmem:[%s3292_s9] sm:$0xff]  }
 0x1cc   :  { %1968 = vmatprep.subr.bf16.mxu0 %v2919_v18 }
 0x1cf   :  { %1969 = vmatpush1.bf16.msra.mxu0 %v2917_v54  ;;  %v2980_v54 = vld [vmem:[%s3292_s9 + $0x8] sm:$0xff]  }
 0x1d0   :  { %1970 = vmatprep.subr.bf16.mxu0 %v2922_v56  ;;  %v2981_v56 = vld [vmem:[%s3292_s9 + $0x10] sm:$0xff]  }
 0x1d3   :  { %1971 = vmatpush1.bf16.msra.mxu0 %v2920_v57  ;;  %v2982_v57 = vld [vmem:[%s3292_s9 + $0x18] sm:$0xff]  }
 0x1d4   :  { %1972 = vmatprep.subr.bf16.mxu0 %v2925_v58  ;;  %v2983_v58 = vld [vmem:[%s3292_s9 + $0x20] sm:$0xff]  }
 0x1d7   :  { %1973 = vmatpush1.bf16.msra.mxu0 %v2923_v59  ;;  %v2984_v59 = vld [vmem:[%s3292_s9 + $0x28] sm:$0xff]  }
 0x1d8   :  { %1974 = vmatprep.subr.bf16.mxu0 %v2928_v60  ;;  %v2985_v60 = vld [vmem:[%s3292_s9 + $0x30] sm:$0xff]  }
 0x1db   :  { %1975 = vmatpush1.bf16.msra.mxu0 %v2926_v61  ;;  %v2986_v61 = vld [vmem:[%s3292_s9 + $0x38] sm:$0xff]  }
 0x1dc   :  { %1976 = vmatprep.subr.bf16.mxu0 %v2931_v62  ;;  %v2662_v62 = vld [vmem:[%s3291_s8] ss:$0 sm:$0xff] }
 0x1df   :  { %1977 = vmatpush1.bf16.msra.mxu0 %v2929_v63 }
 0x1e0   :  { %1978 = vmatprep.subr.bf16.mxu0 %v2934_v0 }
 0x1e3   :  { %1979 = vmatpush1.bf16.msra.mxu0 %v2932_v1 }
 0x1e4   :  { %1980 = vmatprep.subr.bf16.mxu0 %v2937_v2 }
 0x1e7   :  { %1981 = vmatpush1.bf16.msra.mxu0 %v2935_v4 }
 0x1e8   :  { %1982 = vmatprep.subr.bf16.mxu0 %v2940_v5 }
 0x1eb   :  { %1983 = vmatpush1.bf16.msra.mxu0 %v2938_v6 }
 0x1ec   :  { %1984 = vmatprep.subr.bf16.mxu0 %v2943_v7  ;;  %v2668_v7 = vld [vmem:[%s3293_s10] ss:$0 sm:$0xff] }
 0x1ef   :  { %1985 = vmatpush1.bf16.msra.mxu0 %v2941_v8 }
 0x1f0   :  { %1986 = vmatprep.subr.bf16.mxu0 %v2946_v9 }
 0x1f3   :  { %1987 = vmatpush1.bf16.msra.mxu0 %v2944_v10 }
 0x1f4   :  { %1988 = vmatprep.subr.bf16.mxu0 %v2949_v11 }
 0x1f7   :  { %1989 = vmatpush1.bf16.msra.mxu0 %v2947_v12 }
 0x1f8   :  { %1990 = vmatprep.subr.bf16.mxu0 %v2952_v14 }
 0x1fb   :  { %1991 = vmatpush1.bf16.msra.mxu0 %v2950_v15 }
 0x1fc   :  { %1992 = vmatprep.subr.bf16.mxu0 %v2955_v17 }
 0x1ff   :  { %1993 = vmatpush1.bf16.msra.mxu0 %v2953_v19 }
 0x200   :  { %1994 = vmatprep.subr.bf16.mxu0 %v2958_v21 }
 0x203   :  { %1995 = vmatpush1.bf16.msra.mxu0 %v2956_v22 }
 0x206   :  { %1997 = vmatmul.mubr.bf16.vlgmr.msra.gmra.mrb[4].mxu0 %v1059_v24 }
 0x2d9   :  { %v1998_v32 = vpop.f32.mrb[4].mxu0 }
 0x2da   :  { %v2745_v33 = vadd.f32 %v1998_v32, %v1194_v30  ;;  %v2000_v34 = vpop.f32.mrb[5].mxu0 }
 0x2db   :  { %v2746_v35 = vadd.f32 %v2000_v34, %v1198_v31  ;;  %v2002_v36 = vpop.f32.mrb[6].mxu0 }
 0x2dc   :  { %v2005_v37 = vmax.f32 %v2745_v33, 0.0  ;;  %v2003_v38 = vpop.f32.mrb[7].mxu0 }
 0x2dd   :  { %v2006_v39 = vmax.f32 %v2746_v35, 0.0 }
 0x2de   :  { %v2007_v42 = vpack.c.bf16 %v2005_v37, %v2005_v37 }
 0x2df   :  { %v2008_v40 = vpack.c.bf16 %v2006_v39, %v2006_v39 }
 0x2e1   :  { %2176 = vmatprep.mubr.bf16.mxu1 %v2008_v40 }
 0x2e2   :  { %2177 = vmatmul.mubr.bf16.vlgmr.msra.gmra.mrb[12].mxu1 %v2007_v42 }
 0x2e3   :  { %2714 = vmatpush3.bf16.msra.mxu1 %v2975_v41  ;;  %2721 = vmatprep.mubr.msk.bf16.mxu1 %vm3042_vm0, %v3041_v28 }
 0x2e4   :  { %2715 = vmatprep.subr.bf16.mxu1 %v3041_v28 }
 0x2e7   :  { %2716 = vmatpush3.bf16.msra.mxu1 %v2976_v43 }
 0x2e8   :  { %2717 = vmatprep.subr.bf16.mxu1 %v3041_v28 }
 0x2eb   :  { %2718 = vmatpush3.bf16.msra.mxu1 %v2977_v44 }
 0x2ec   :  { %2719 = vmatprep.subr.bf16.mxu1 %v3041_v28 }
 0x2ef   :  { %2720 = vmatpush3.bf16.msra.mxu1 %v2978_v46 }
 0x2f0   :  { %2725 = vmatprep.subr.bf16.mxu1 %v3041_v28 }
 0x3b5   :  { %v2693_v47 = vpop.f32.mrb[12].mxu1 }
 0x3b6   :  { %v2694_v48 = vpop.f32.mrb[13].mxu1 }
 0x3b7   :  { %v2695_v49 = vadd.f32 %v2694_v48, %v2693_v47  ;;  %v2696_v50 = vpop.f32.mrb[14].mxu1 }
 0x3b8   :  { %v2697_v3 = vpop.f32.mrb[15].mxu1 }
 0x3b9   :  { %v2179_v51 = vadd.f32 %v2695_v49, %v2645_v55 }
 0x3bb   :  { %v2184_v52 = vmax.f32 %v2179_v51, 0.0 }
 0x3bd   :  { %v2185_v18 = vpack.c.bf16 %v2184_v52, %v2184_v52 }
 0x3bf   :  { %2722 = vmatmul.mubr.msk.bf16.vlgmr.msra.gmra.mrb[16].mxu1 %vm2225_vm1, %v2185_v18 }
 0x3c0   :  { %2726 = vmatpush3.bf16.msra.mxu1 %v2979_v53  ;;  %2741 = vmatprep.mubr.msk.bf16.mxu1 %vm3042_vm0, %v3041_v28 }
 0x3c1   :  { %2727 = vmatprep.subr.bf16.mxu1 %v3041_v28 }
 0x3c4   :  { %2728 = vmatpush3.bf16.msra.mxu1 %v2980_v54 }
 0x3c5   :  { %2729 = vmatprep.subr.bf16.mxu1 %v3041_v28 }
 0x3c8   :  { %2730 = vmatpush3.bf16.msra.mxu1 %v2981_v56 }
 0x3c9   :  { %2731 = vmatprep.subr.bf16.mxu1 %v3041_v28 }
 0x3cc   :  { %2732 = vmatpush3.bf16.msra.mxu1 %v2982_v57 }
 0x3cd   :  { %2733 = vmatprep.subr.bf16.mxu1 %v3041_v28 }
 0x3d0   :  { %2734 = vmatpush3.bf16.msra.mxu1 %v2983_v58 }
 0x3d1   :  { %2735 = vmatprep.subr.bf16.mxu1 %v3041_v28 }
 0x3d4   :  { %2736 = vmatpush3.bf16.msra.mxu1 %v2984_v59 }
 0x3d5   :  { %2737 = vmatprep.subr.bf16.mxu1 %v3041_v28 }
 0x3d8   :  { %2738 = vmatpush3.bf16.msra.mxu1 %v2985_v60 }
 0x3d9   :  { %2739 = vmatprep.subr.bf16.mxu1 %v3041_v28 }
 0x3dc   :  { %2740 = vmatpush3.bf16.msra.mxu1 %v2986_v61 }
 0x492   :  { %v2263_v63 = vpop.f32.mrb[16].mxu1 }
 0x493   :  { %v2264_v0 = vadd.f32 %v2662_v62, %v2263_v63  ;;  %v2723_v1 = vpop.f32.mrb[17].mxu1 }
 0x494   :  { %v2266_v2 = vpop.f32.mrb[18].mxu1 }
 0x495   :  { %v2269_v4 = vmax.f32 %v2264_v0, 0.0  ;;  %v2724_v5 = vpop.f32.mrb[19].mxu1 }
 0x497   :  { %v2270_v6 = vpack.c.bf16 %v2269_v4, %v2269_v4 }
 0x499   :  { %2742 = vmatmul.mubr.bf16.vlgmr.msra.gmra.mrb[20].mxu1 %v2270_v6 }
 0x56c   :  { %v2376_v8 = vpop.f32.mrb[20].mxu1 }
 0x56d   :  { %v2377_v9 = vadd.f32 %v2668_v7, %v2376_v8  ;;  %v2743_v10 = vpop.f32.mrb[21].mxu1 }
 0x56e   :  { %v2379_v11 = vpop.f32.mrb[22].mxu1 }
 0x56f   :  { %2382 = vst [vmem:[%s3294_s11] sm:$0xff] %v2377_v9  ;;  %v2744_v12 = vpop.f32.mrb[23].mxu1 }
 0x570   :  { %2387 = vsyncpa [#allocation3], 1 }
 0x571   :  { %2388 = vsyncpa [#allocation5], 1 }

</bundles_post_ra>
